<compile_context>
chip_gen: v7x
topology: tpu7x:2x2x1
jax: 0.10.0
libtpu: 0.0.40
codegen_flags: <defaults>
</compile_context>

<pallas_src>
import jax
import jax.numpy as jnp
from jax import lax
from jax.experimental import pallas as pl
from jax.experimental.pallas import tpu as pltpu

EPS = 1e-5  # nn.InstanceNorm2d default eps


def double_conv_kernel(x_ref, w1_ref, w2_ref, s1_ref, s2_ref, o_ref):
    # x_ref  : (B, H, W*Cin)   bf16 activations, (w, c) fused on the lane axis
    # w1_ref : (3, W*Cin,  W*Cmid) bf16 conv1 banded weights, one slab per kernel row dy
    # w2_ref : (3, W*Cmid, W*Cout) bf16 conv2 banded weights
    # s*_ref : (W*C, C)        f32 0/1 channel-selector matrices for InstanceNorm stats
    # o_ref  : (B, H, W*Cout)  f32 output slab (written exactly once)
    B, H, WCin = x_ref.shape
    WCout = o_ref.shape[-1]
    M = B * H

    def conv3x3(xf, wb_ref):
        # xf: (M, W*Ci) bf16.  out[b,h] = x[b,h-1] @ wb[0] + x[b,h] @ wb[1] + x[b,h+1] @ wb[2]
        # Rows outside [0, H) contribute zero (== padding=1 along H); padding along W is
        # already folded into the band structure of wb.  The row halo is applied in
        # registers: pltpu.roll on the sublane axis (XLU) + an iota row mask zeroes the
        # rows that wrapped across the image / batch boundary.
        wco = wb_ref.shape[-1]
        p0 = jnp.dot(xf, wb_ref[0], preferred_element_type=jnp.float32)  # (M, wco) f32
        p1 = jnp.dot(xf, wb_ref[1], preferred_element_type=jnp.float32)
        p2 = jnp.dot(xf, wb_ref[2], preferred_element_type=jnp.float32)
        hrow = lax.broadcasted_iota(jnp.int32, (M, wco), 0) % H
        down = jnp.where(hrow > 0, pltpu.roll(p0, shift=1, axis=0), 0.0)       # += p0[h-1]
        up = jnp.where(hrow < H - 1, pltpu.roll(p2, shift=M - 1, axis=0), 0.0)  # += p2[h+1]
        return p1 + down + up

    def lane_tile(v, w):
        # (B, C) -> (B, w*C): replicate per-channel stats across the w-major lane layout
        # (pure VPU broadcast + small reshape; no MXU pushes).
        b, c = v.shape
        return jnp.broadcast_to(v[:, None, :], (b, w, c)).reshape(b, w * c)

    def inst_norm_relu(yf, sel_ref):
        # yf: (M, W*C) f32.  Parameter-free InstanceNorm2d (affine=False) + ReLU.
        wc, c = sel_ref.shape
        w = wc // c
        y3 = yf.reshape(B, H, wc)
        sum_h = jnp.sum(y3, axis=1)                                 # (B, WC) reduce over H
        sum_h2 = jnp.sum(y3 * y3, axis=1)                           # (B, WC)
        stacked = jnp.concatenate([sum_h, sum_h2], axis=0)          # (2B, WC)
        sums = jnp.dot(stacked, sel_ref[...],
                       preferred_element_type=jnp.float32)          # (2B, C) single dot
        inv_n = 1.0 / float(H * w)
        mean = sums[:B] * inv_n                                     # (B, C)
        ex2 = sums[B:] * inv_n
        # Single-pass variance in f32; post-conv activations are near zero-mean (biases
        # dropped), so no catastrophic cancellation at these magnitudes.
        var = ex2 - mean * mean
        inv = lax.rsqrt(var + EPS)                                  # (B, C), EUP rsqrt
        scale = lane_tile(inv, w)[:, None, :]                       # (B, 1, WC)
        shift = lane_tile(-mean * inv, w)[:, None, :]
        return jnp.maximum(y3 * scale + shift, 0.0).reshape(M, wc)

    xf = x_ref[...].reshape(M, WCin)                                # bf16
    y1 = inst_norm_relu(conv3x3(xf, w1_ref), s1_ref)                # f32
    y2 = inst_norm_relu(conv3x3(y1.astype(jnp.bfloat16), w2_ref), s2_ref)
    # TODO(synk): nn.Dropout(0.3) is inference-mode identity (no torch-matching RNG).
    o_ref[...] = y2.reshape(B, H, WCout).astype(o_ref.dtype)        # single lane-dense store


def _banded_weights(w_oihw, W):
    """(Co, Ci, 3, 3) OIHW -> (3, W*Ci, W*Co): fold the kernel-x taps and the W-direction
    zero padding into a block-Toeplitz matrix so each conv kernel-row is one MXU dot.
    NOTE: over-computes through the zero band (~W/3 extra MACs); for large W, tile W into
    lane strips instead."""
    w_hwio = jnp.transpose(w_oihw, (2, 3, 1, 0)).astype(jnp.float32)   # (3, 3, Ci, Co)
    bands = []
    for dy in range(3):
        band = sum(jnp.kron(jnp.eye(W, k=1 - dx, dtype=jnp.float32), w_hwio[dy, dx])
                   for dx in range(3))
        bands.append(band)
    return jnp.stack(bands, axis=0)


def _channel_selector(W, C):
    """(W*C, C) 0/1 matrix with S[w*C + c, c'] = (c == c')."""
    return jnp.kron(jnp.ones((W, 1), jnp.float32), jnp.eye(C, dtype=jnp.float32))


def _pick_batch_block(N, H, target_rows=256, max_rows=2048):
    """Largest useful batch block: aim for b_blk*H >= target_rows so the matmul M dim
    feeds the 256-deep MXU (v6e/v7x), capped by max_rows to bound VMEM.  Do NOT force
    multiple grid steps: grid-step overhead is pure cost on single-TC v5e/v6e."""
    divisors = [d for d in range(1, N + 1) if N % d == 0]
    fitting = [d for d in divisors if d * H <= max_rows] or [1]
    deep = [d for d in fitting if d * H >= target_rows]
    return min(deep) if deep else max(fitting)


def double_conv(x_nchw, w1, b1, w2, b2):
    """DoubleConv forward (inference).  b1/b2 accepted for parity with the PyTorch module
    but are mathematically dead under the no-affine InstanceNorm, so they are dropped."""
    del b1, b2
    N, Cin, H, W = x_nchw.shape
    Cmid = w1.shape[0]
    Cout = w2.shape[0]
    b_blk = _pick_batch_block(N, H)

    # NCHW -> lane-dense (N, H, W*C) slab, bf16 for the MXU; padding/halo fused in-kernel.
    x = jnp.transpose(x_nchw, (0, 2, 3, 1)).reshape(N, H, W * Cin).astype(jnp.bfloat16)
    w1b = _banded_weights(w1, W).astype(jnp.bfloat16)   # (3, W*Cin,  W*Cmid)
    w2b = _banded_weights(w2, W).astype(jnp.bfloat16)   # (3, W*Cmid, W*Cout)
    s1 = _channel_selector(W, Cmid)                     # stats stay in f32
    s2 = _channel_selector(W, Cout)

    # NOTE: for realistic channel widths, add an H-strip grid axis (1-row halo) sized for
    # v7x's 64 MiB VMEM and single-buffer the constant weight/selector blocks.
    out = pl.pallas_call(
        double_conv_kernel,
        out_shape=jax.ShapeDtypeStruct((N, H, W * Cout), jnp.float32),
        grid_spec=pltpu.PrefetchScalarGridSpec(
            num_scalar_prefetch=0,
            grid=(N // b_blk,),
            in_specs=[
                pl.BlockSpec((b_blk, H, W * Cin), lambda n: (n, 0, 0)),
                pl.BlockSpec((3, W * Cin, W * Cmid), lambda n: (0, 0, 0)),
                pl.BlockSpec((3, W * Cmid, W * Cout), lambda n: (0, 0, 0)),
                pl.BlockSpec((W * Cmid, Cmid), lambda n: (0, 0)),
                pl.BlockSpec((W * Cout, Cout), lambda n: (0, 0)),
            ],
            out_specs=pl.BlockSpec((b_blk, H, W * Cout), lambda n: (n, 0, 0)),
        ),
        compiler_params=pltpu.CompilerParams(
            dimension_semantics=("parallel",),
        ),
    )(x, w1b, w2b, s1, s2)

    return jnp.transpose(out.reshape(N, H, W, Cout), (0, 3, 1, 2))    # -> NCHW


def double_conv_ref(x, w1, b1, w2, b2):
    """Pure-JAX f32 reference (inference mode: dropout = identity), biases included
    (they must cancel under the parameter-free InstanceNorm)."""
    def conv(x, w, b):
        y = lax.conv_general_dilated(x, w, window_strides=(1, 1),
                                     padding=((1, 1), (1, 1)),
                                     dimension_numbers=("NCHW", "OIHW", "NCHW"))
        return y + b[None, :, None, None]

    def instnorm_relu(y):
        m = jnp.mean(y, axis=(2, 3), keepdims=True)
        v = jnp.mean((y - m) ** 2, axis=(2, 3), keepdims=True)
        return jnp.maximum((y - m) * lax.rsqrt(v + EPS), 0.0)

    y = instnorm_relu(conv(x, w1, b1))
    y = instnorm_relu(conv(y, w2, b2))
    return y


if __name__ == "__main__":
    key = jax.random.PRNGKey(0)
    N, Cin, H, W = 2, 4, 16, 16
    Cmid = Cout = 8  # midChannel defaults to outputChannel

    kx, k1, kb1, k2, kb2 = jax.random.split(key, 5)
    x = jax.random.normal(kx, (N, Cin, H, W), jnp.float32)
    w1 = jax.random.normal(k1, (Cmid, Cin, 3, 3), jnp.float32) * 0.2
    b1 = jax.random.normal(kb1, (Cmid,), jnp.float32) * 0.05
    w2 = jax.random.normal(k2, (Cout, Cmid, 3, 3), jnp.float32) * 0.2
    b2 = jax.random.normal(kb2, (Cout,), jnp.float32) * 0.05

    out = jax.block_until_ready(double_conv(x, w1, b1, w2, b2))
    ref = jax.block_until_ready(double_conv_ref(x, w1, b1, w2, b2))

    assert out.shape == (N, Cout, H, W), out.shape
    err = float(jnp.max(jnp.abs(out - ref)))
    # bf16 MXU inputs (f32 accumulation / f32 stats) vs a pure-f32 reference.
    assert jnp.allclose(out, ref, rtol=3e-2, atol=3e-2), err
    print("KERNEL_OK")
</pallas_src>

<mosaic_0001>
module attributes {stable_mosaic.version = 11 : i64} {
  func.func @double_conv_kernel(%arg0: i32, %arg1: memref<2x16x64xbf16, #tpu.memory_space<vmem>>, %arg2: memref<3x64x128xbf16, #tpu.memory_space<vmem>>, %arg3: memref<3x128x128xbf16, #tpu.memory_space<vmem>>, %arg4: memref<128x8xf32, #tpu.memory_space<vmem>>, %arg5: memref<128x8xf32, #tpu.memory_space<vmem>>, %arg6: memref<2x16x128xf32, #tpu.memory_space<vmem>>) attributes {dimension_semantics = [#tpu.dimension_semantics<parallel>], iteration_bounds = array<i64: 1>, scalar_prefetch = 0 : i64, scratch_operands = 0 : i64, tpu.core_type = #tpu.core_type<tc>, window_params = [{transform_indices = @transform_0, window_bounds = array<i64: 2, 16, 64>}, {pipeline_mode = #tpu.pipeline_mode<synchronous>, transform_indices = @transform_1, window_bounds = array<i64: 3, 64, 128>}, {pipeline_mode = #tpu.pipeline_mode<synchronous>, transform_indices = @transform_2, window_bounds = array<i64: 3, 128, 128>}, {pipeline_mode = #tpu.pipeline_mode<synchronous>, transform_indices = @transform_3, window_bounds = array<i64: 128, 8>}, {pipeline_mode = #tpu.pipeline_mode<synchronous>, transform_indices = @transform_4, window_bounds = array<i64: 128, 8>}, {transform_indices = @transform_5, window_bounds = array<i64: 2, 16, 128>}]} {
    %c0 = arith.constant 0 : index
    %c0_0 = arith.constant 0 : index
    %c0_1 = arith.constant 0 : index
    %0 = vector.load %arg1[%c0, %c0_0, %c0_1] : memref<2x16x64xbf16, #tpu.memory_space<vmem>>, vector<2x16x64xbf16>
    %1 = vector.shape_cast %0 : vector<2x16x64xbf16> to vector<32x64xbf16>
    %c0_2 = arith.constant 0 : index
    %c0_3 = arith.constant 0 : index
    %c0_4 = arith.constant 0 : index
    %2 = vector.load %arg2[%c0_2, %c0_3, %c0_4] : memref<3x64x128xbf16, #tpu.memory_space<vmem>>, vector<1x64x128xbf16>
    %3 = vector.shape_cast %2 : vector<1x64x128xbf16> to vector<64x128xbf16>
    %cst = arith.constant dense<0.000000e+00> : vector<32x128xf32>
    %4 = tpu.matmul %1, %3, %cst {dimension_numbers = #tpu.dot_dimension_numbers<[1], [0], [0], [1], [0, 0, 1, 1], [], []>} : vector<32x64xbf16>, vector<64x128xbf16>, vector<32x128xf32> -> vector<32x128xf32>
    %c1 = arith.constant 1 : index
    %c0_5 = arith.constant 0 : index
    %c0_6 = arith.constant 0 : index
    %5 = vector.load %arg2[%c1, %c0_5, %c0_6] : memref<3x64x128xbf16, #tpu.memory_space<vmem>>, vector<1x64x128xbf16>
    %6 = vector.shape_cast %5 : vector<1x64x128xbf16> to vector<64x128xbf16>
    %cst_7 = arith.constant dense<0.000000e+00> : vector<32x128xf32>
    %7 = tpu.matmul %1, %6, %cst_7 {dimension_numbers = #tpu.dot_dimension_numbers<[1], [0], [0], [1], [0, 0, 1, 1], [], []>} : vector<32x64xbf16>, vector<64x128xbf16>, vector<32x128xf32> -> vector<32x128xf32>
    %c2 = arith.constant 2 : index
    %c0_8 = arith.constant 0 : index
    %c0_9 = arith.constant 0 : index
    %8 = vector.load %arg2[%c2, %c0_8, %c0_9] : memref<3x64x128xbf16, #tpu.memory_space<vmem>>, vector<1x64x128xbf16>
    %9 = vector.shape_cast %8 : vector<1x64x128xbf16> to vector<64x128xbf16>
    %cst_10 = arith.constant dense<0.000000e+00> : vector<32x128xf32>
    %10 = tpu.matmul %1, %9, %cst_10 {dimension_numbers = #tpu.dot_dimension_numbers<[1], [0], [0], [1], [0, 0, 1, 1], [], []>} : vector<32x64xbf16>, vector<64x128xbf16>, vector<32x128xf32> -> vector<32x128xf32>
    %11 = tpu.iota {dimensions = array<i32: 0>} : vector<32x128xi32>
    %c16_i32 = arith.constant 16 : i32
    %c0_i32 = arith.constant 0 : i32
    %12 = arith.cmpi eq, %c16_i32, %c0_i32 : i32
    %c1_i32 = arith.constant 1 : i32
    %13 = arith.select %12, %c1_i32, %c16_i32 : i32
    %14 = vector.broadcast %13 : i32 to vector<32x128xi32>
    %15 = arith.remsi %11, %14 : vector<32x128xi32>
    %c0_i32_11 = arith.constant 0 : i32
    %16 = vector.broadcast %c0_i32_11 : i32 to vector<32x128xi32>
    %17 = arith.cmpi ne, %15, %16 : vector<32x128xi32>
    %c0_i32_12 = arith.constant 0 : i32
    %18 = vector.broadcast %c0_i32_12 : i32 to vector<32x128xi32>
    %19 = arith.cmpi slt, %15, %18 : vector<32x128xi32>
    %c0_i32_13 = arith.constant 0 : i32
    %20 = arith.cmpi slt, %13, %c0_i32_13 : i32
    %21 = vector.broadcast %20 : i1 to vector<32x128xi1>
    %22 = vector.broadcast %21 : vector<32x128xi1> to vector<32x128xi1>
    %23 = arith.xori %19, %22 : vector<32x128xi1>
    %24 = arith.andi %23, %17 : vector<32x128xi1>
    %25 = vector.broadcast %13 : i32 to vector<32x128xi32>
    %26 = arith.addi %15, %25 : vector<32x128xi32>
    %27 = arith.select %24, %26, %15 : vector<32x128xi1>, vector<32x128xi32>
    %c0_i32_14 = arith.constant 0 : i32
    %28 = vector.broadcast %c0_i32_14 : i32 to vector<32x128xi32>
    %29 = arith.cmpi sgt, %27, %28 : vector<32x128xi32>
    %c1_i32_15 = arith.constant 1 : i32
    %30 = tpu.dynamic_rotate %4 by %c1_i32_15 dim 0 : vector<32x128xf32>, i32 -> vector<32x128xf32>
    %cst_16 = arith.constant 0.000000e+00 : f32
    %31 = vector.broadcast %cst_16 : f32 to vector<32x128xf32>
    %32 = arith.select %29, %30, %31 : vector<32x128xi1>, vector<32x128xf32>
    %c15_i32 = arith.constant 15 : i32
    %33 = vector.broadcast %c15_i32 : i32 to vector<32x128xi32>
    %34 = arith.cmpi slt, %27, %33 : vector<32x128xi32>
    %c31_i32 = arith.constant 31 : i32
    %35 = tpu.dynamic_rotate %10 by %c31_i32 dim 0 : vector<32x128xf32>, i32 -> vector<32x128xf32>
    %cst_17 = arith.constant 0.000000e+00 : f32
    %36 = vector.broadcast %cst_17 : f32 to vector<32x128xf32>
    %37 = arith.select %34, %35, %36 : vector<32x128xi1>, vector<32x128xf32>
    %38 = arith.addf %7, %32 : vector<32x128xf32>
    %39 = arith.addf %38, %37 : vector<32x128xf32>
    %40 = vector.shape_cast %39 : vector<32x128xf32> to vector<2x16x128xf32>
    %cst_18 = arith.constant dense<0.000000e+00> : vector<2x128xf32>
    %41 = vector.multi_reduction <add>, %40, %cst_18 [1] : vector<2x16x128xf32> to vector<2x128xf32>
    %42 = arith.mulf %40, %40 : vector<2x16x128xf32>
    %cst_19 = arith.constant dense<0.000000e+00> : vector<2x128xf32>
    %43 = vector.multi_reduction <add>, %42, %cst_19 [1] : vector<2x16x128xf32> to vector<2x128xf32>
    %44 = tpu.concatenate %41, %43 in 0 : vector<2x128xf32>, vector<2x128xf32> -> vector<4x128xf32>
    %c0_20 = arith.constant 0 : index
    %c0_21 = arith.constant 0 : index
    %45 = vector.load %arg4[%c0_20, %c0_21] : memref<128x8xf32, #tpu.memory_space<vmem>>, vector<128x8xf32>
    %cst_22 = arith.constant dense<0.000000e+00> : vector<4x8xf32>
    %46 = tpu.matmul %44, %45, %cst_22 {dimension_numbers = #tpu.dot_dimension_numbers<[1], [0], [0], [1], [0, 0, 1, 1], [], []>} : vector<4x128xf32>, vector<128x8xf32>, vector<4x8xf32> -> vector<4x8xf32>
    %47 = vector.extract_strided_slice %46 {offsets = [0, 0], sizes = [2, 8], strides = [1, 1]} : vector<4x8xf32> to vector<2x8xf32>
    %cst_23 = arith.constant 3.906250e-03 : f32
    %48 = vector.broadcast %cst_23 : f32 to vector<2x8xf32>
    %49 = arith.mulf %47, %48 : vector<2x8xf32>
    %50 = vector.extract_strided_slice %46 {offsets = [2, 0], sizes = [2, 8], strides = [1, 1]} : vector<4x8xf32> to vector<2x8xf32>
    %cst_24 = arith.constant 3.906250e-03 : f32
    %51 = vector.broadcast %cst_24 : f32 to vector<2x8xf32>
    %52 = arith.mulf %50, %51 : vector<2x8xf32>
    %53 = arith.mulf %49, %49 : vector<2x8xf32>
    %54 = arith.subf %52, %53 : vector<2x8xf32>
    %cst_25 = arith.constant 9.99999974E-6 : f32
    %55 = vector.broadcast %cst_25 : f32 to vector<2x8xf32>
    %56 = arith.addf %54, %55 : vector<2x8xf32>
    %57 = math.rsqrt %56 : vector<2x8xf32>
    %58 = vector.shape_cast %57 : vector<2x8xf32> to vector<2x1x8xf32>
    %59 = vector.shape_cast %58 : vector<2x1x8xf32> to vector<2x1x8xf32>
    %60 = vector.broadcast %59 : vector<2x1x8xf32> to vector<2x16x8xf32>
    %61 = vector.shape_cast %60 : vector<2x16x8xf32> to vector<2x128xf32>
    %62 = vector.shape_cast %61 : vector<2x128xf32> to vector<2x1x128xf32>
    %cst_26 = arith.constant 0.000000e+00 : f32
    %63 = vector.broadcast %cst_26 : f32 to vector<2x8xf32>
    %64 = arith.subf %63, %49 : vector<2x8xf32>
    %65 = arith.mulf %64, %57 : vector<2x8xf32>
    %66 = vector.shape_cast %65 : vector<2x8xf32> to vector<2x1x8xf32>
    %67 = vector.shape_cast %66 : vector<2x1x8xf32> to vector<2x1x8xf32>
    %68 = vector.broadcast %67 : vector<2x1x8xf32> to vector<2x16x8xf32>
    %69 = vector.shape_cast %68 : vector<2x16x8xf32> to vector<2x128xf32>
    %70 = vector.shape_cast %69 : vector<2x128xf32> to vector<2x1x128xf32>
    %71 = vector.broadcast %62 : vector<2x1x128xf32> to vector<2x16x128xf32>
    %72 = arith.mulf %40, %71 : vector<2x16x128xf32>
    %73 = vector.broadcast %70 : vector<2x1x128xf32> to vector<2x16x128xf32>
    %74 = arith.addf %72, %73 : vector<2x16x128xf32>
    %cst_27 = arith.constant 0.000000e+00 : f32
    %75 = vector.broadcast %cst_27 : f32 to vector<2x16x128xf32>
    %76 = arith.maximumf %74, %75 : vector<2x16x128xf32>
    %77 = vector.shape_cast %76 : vector<2x16x128xf32> to vector<32x128xf32>
    %78 = arith.truncf %77 : vector<32x128xf32> to vector<32x128xbf16>
    %c0_28 = arith.constant 0 : index
    %c0_29 = arith.constant 0 : index
    %c0_30 = arith.constant 0 : index
    %79 = vector.load %arg3[%c0_28, %c0_29, %c0_30] : memref<3x128x128xbf16, #tpu.memory_space<vmem>>, vector<1x128x128xbf16>
    %80 = vector.shape_cast %79 : vector<1x128x128xbf16> to vector<128x128xbf16>
    %cst_31 = arith.constant dense<0.000000e+00> : vector<32x128xf32>
    %81 = tpu.matmul %78, %80, %cst_31 {dimension_numbers = #tpu.dot_dimension_numbers<[1], [0], [0], [1], [0, 0, 1, 1], [], []>} : vector<32x128xbf16>, vector<128x128xbf16>, vector<32x128xf32> -> vector<32x128xf32>
    %c1_32 = arith.constant 1 : index
    %c0_33 = arith.constant 0 : index
    %c0_34 = arith.constant 0 : index
    %82 = vector.load %arg3[%c1_32, %c0_33, %c0_34] : memref<3x128x128xbf16, #tpu.memory_space<vmem>>, vector<1x128x128xbf16>
    %83 = vector.shape_cast %82 : vector<1x128x128xbf16> to vector<128x128xbf16>
    %cst_35 = arith.constant dense<0.000000e+00> : vector<32x128xf32>
    %84 = tpu.matmul %78, %83, %cst_35 {dimension_numbers = #tpu.dot_dimension_numbers<[1], [0], [0], [1], [0, 0, 1, 1], [], []>} : vector<32x128xbf16>, vector<128x128xbf16>, vector<32x128xf32> -> vector<32x128xf32>
    %c2_36 = arith.constant 2 : index
    %c0_37 = arith.constant 0 : index
    %c0_38 = arith.constant 0 : index
    %85 = vector.load %arg3[%c2_36, %c0_37, %c0_38] : memref<3x128x128xbf16, #tpu.memory_space<vmem>>, vector<1x128x128xbf16>
    %86 = vector.shape_cast %85 : vector<1x128x128xbf16> to vector<128x128xbf16>
    %cst_39 = arith.constant dense<0.000000e+00> : vector<32x128xf32>
    %87 = tpu.matmul %78, %86, %cst_39 {dimension_numbers = #tpu.dot_dimension_numbers<[1], [0], [0], [1], [0, 0, 1, 1], [], []>} : vector<32x128xbf16>, vector<128x128xbf16>, vector<32x128xf32> -> vector<32x128xf32>
    %88 = tpu.iota {dimensions = array<i32: 0>} : vector<32x128xi32>
    %c16_i32_40 = arith.constant 16 : i32
    %c0_i32_41 = arith.constant 0 : i32
    %89 = arith.cmpi eq, %c16_i32_40, %c0_i32_41 : i32
    %c1_i32_42 = arith.constant 1 : i32
    %90 = arith.select %89, %c1_i32_42, %c16_i32_40 : i32
    %91 = vector.broadcast %90 : i32 to vector<32x128xi32>
    %92 = arith.remsi %88, %91 : vector<32x128xi32>
    %c0_i32_43 = arith.constant 0 : i32
    %93 = vector.broadcast %c0_i32_43 : i32 to vector<32x128xi32>
    %94 = arith.cmpi ne, %92, %93 : vector<32x128xi32>
    %c0_i32_44 = arith.constant 0 : i32
    %95 = vector.broadcast %c0_i32_44 : i32 to vector<32x128xi32>
    %96 = arith.cmpi slt, %92, %95 : vector<32x128xi32>
    %c0_i32_45 = arith.constant 0 : i32
    %97 = arith.cmpi slt, %90, %c0_i32_45 : i32
    %98 = vector.broadcast %97 : i1 to vector<32x128xi1>
    %99 = vector.broadcast %98 : vector<32x128xi1> to vector<32x128xi1>
    %100 = arith.xori %96, %99 : vector<32x128xi1>
    %101 = arith.andi %100, %94 : vector<32x128xi1>
    %102 = vector.broadcast %90 : i32 to vector<32x128xi32>
    %103 = arith.addi %92, %102 : vector<32x128xi32>
    %104 = arith.select %101, %103, %92 : vector<32x128xi1>, vector<32x128xi32>
    %c0_i32_46 = arith.constant 0 : i32
    %105 = vector.broadcast %c0_i32_46 : i32 to vector<32x128xi32>
    %106 = arith.cmpi sgt, %104, %105 : vector<32x128xi32>
    %c1_i32_47 = arith.constant 1 : i32
    %107 = tpu.dynamic_rotate %81 by %c1_i32_47 dim 0 : vector<32x128xf32>, i32 -> vector<32x128xf32>
    %cst_48 = arith.constant 0.000000e+00 : f32
    %108 = vector.broadcast %cst_48 : f32 to vector<32x128xf32>
    %109 = arith.select %106, %107, %108 : vector<32x128xi1>, vector<32x128xf32>
    %c15_i32_49 = arith.constant 15 : i32
    %110 = vector.broadcast %c15_i32_49 : i32 to vector<32x128xi32>
    %111 = arith.cmpi slt, %104, %110 : vector<32x128xi32>
    %c31_i32_50 = arith.constant 31 : i32
    %112 = tpu.dynamic_rotate %87 by %c31_i32_50 dim 0 : vector<32x128xf32>, i32 -> vector<32x128xf32>
    %cst_51 = arith.constant 0.000000e+00 : f32
    %113 = vector.broadcast %cst_51 : f32 to vector<32x128xf32>
    %114 = arith.select %111, %112, %113 : vector<32x128xi1>, vector<32x128xf32>
    %115 = arith.addf %84, %109 : vector<32x128xf32>
    %116 = arith.addf %115, %114 : vector<32x128xf32>
    %117 = vector.shape_cast %116 : vector<32x128xf32> to vector<2x16x128xf32>
    %cst_52 = arith.constant dense<0.000000e+00> : vector<2x128xf32>
    %118 = vector.multi_reduction <add>, %117, %cst_52 [1] : vector<2x16x128xf32> to vector<2x128xf32>
    %119 = arith.mulf %117, %117 : vector<2x16x128xf32>
    %cst_53 = arith.constant dense<0.000000e+00> : vector<2x128xf32>
    %120 = vector.multi_reduction <add>, %119, %cst_53 [1] : vector<2x16x128xf32> to vector<2x128xf32>
    %121 = tpu.concatenate %118, %120 in 0 : vector<2x128xf32>, vector<2x128xf32> -> vector<4x128xf32>
    %c0_54 = arith.constant 0 : index
    %c0_55 = arith.constant 0 : index
    %122 = vector.load %arg5[%c0_54, %c0_55] : memref<128x8xf32, #tpu.memory_space<vmem>>, vector<128x8xf32>
    %cst_56 = arith.constant dense<0.000000e+00> : vector<4x8xf32>
    %123 = tpu.matmul %121, %122, %cst_56 {dimension_numbers = #tpu.dot_dimension_numbers<[1], [0], [0], [1], [0, 0, 1, 1], [], []>} : vector<4x128xf32>, vector<128x8xf32>, vector<4x8xf32> -> vector<4x8xf32>
    %124 = vector.extract_strided_slice %123 {offsets = [0, 0], sizes = [2, 8], strides = [1, 1]} : vector<4x8xf32> to vector<2x8xf32>
    %cst_57 = arith.constant 3.906250e-03 : f32
    %125 = vector.broadcast %cst_57 : f32 to vector<2x8xf32>
    %126 = arith.mulf %124, %125 : vector<2x8xf32>
    %127 = vector.extract_strided_slice %123 {offsets = [2, 0], sizes = [2, 8], strides = [1, 1]} : vector<4x8xf32> to vector<2x8xf32>
    %cst_58 = arith.constant 3.906250e-03 : f32
    %128 = vector.broadcast %cst_58 : f32 to vector<2x8xf32>
    %129 = arith.mulf %127, %128 : vector<2x8xf32>
    %130 = arith.mulf %126, %126 : vector<2x8xf32>
    %131 = arith.subf %129, %130 : vector<2x8xf32>
    %cst_59 = arith.constant 9.99999974E-6 : f32
    %132 = vector.broadcast %cst_59 : f32 to vector<2x8xf32>
    %133 = arith.addf %131, %132 : vector<2x8xf32>
    %134 = math.rsqrt %133 : vector<2x8xf32>
    %135 = vector.shape_cast %134 : vector<2x8xf32> to vector<2x1x8xf32>
    %136 = vector.shape_cast %135 : vector<2x1x8xf32> to vector<2x1x8xf32>
    %137 = vector.broadcast %136 : vector<2x1x8xf32> to vector<2x16x8xf32>
    %138 = vector.shape_cast %137 : vector<2x16x8xf32> to vector<2x128xf32>
    %139 = vector.shape_cast %138 : vector<2x128xf32> to vector<2x1x128xf32>
    %cst_60 = arith.constant 0.000000e+00 : f32
    %140 = vector.broadcast %cst_60 : f32 to vector<2x8xf32>
    %141 = arith.subf %140, %126 : vector<2x8xf32>
    %142 = arith.mulf %141, %134 : vector<2x8xf32>
    %143 = vector.shape_cast %142 : vector<2x8xf32> to vector<2x1x8xf32>
    %144 = vector.shape_cast %143 : vector<2x1x8xf32> to vector<2x1x8xf32>
    %145 = vector.broadcast %144 : vector<2x1x8xf32> to vector<2x16x8xf32>
    %146 = vector.shape_cast %145 : vector<2x16x8xf32> to vector<2x128xf32>
    %147 = vector.shape_cast %146 : vector<2x128xf32> to vector<2x1x128xf32>
    %148 = vector.broadcast %139 : vector<2x1x128xf32> to vector<2x16x128xf32>
    %149 = arith.mulf %117, %148 : vector<2x16x128xf32>
    %150 = vector.broadcast %147 : vector<2x1x128xf32> to vector<2x16x128xf32>
    %151 = arith.addf %149, %150 : vector<2x16x128xf32>
    %cst_61 = arith.constant 0.000000e+00 : f32
    %152 = vector.broadcast %cst_61 : f32 to vector<2x16x128xf32>
    %153 = arith.maximumf %151, %152 : vector<2x16x128xf32>
    %154 = vector.shape_cast %153 : vector<2x16x128xf32> to vector<32x128xf32>
    %155 = vector.shape_cast %154 : vector<32x128xf32> to vector<2x16x128xf32>
    %c0_62 = arith.constant 0 : index
    %c0_63 = arith.constant 0 : index
    %c0_64 = arith.constant 0 : index
    %156 = vector.load %arg6[%c0_62, %c0_63, %c0_64] : memref<2x16x128xf32, #tpu.memory_space<vmem>>, vector<2x16x128xf32>
    tpu.vector_store %arg6[%c0_62, %c0_63, %c0_64], %155 {strides = array<i32>} : memref<2x16x128xf32, #tpu.memory_space<vmem>>, vector<2x16x128xf32>,
    return
  }
  func.func @transform_0(%arg0: i32) -> (i32, i32, i32) {
    %c0_i32 = arith.constant 0 : i32
    %c0_i32_0 = arith.constant 0 : i32
    %c0_i32_1 = arith.constant 0 : i32
    return %arg0, %c0_i32, %c0_i32_0 : i32, i32, i32
  }
  func.func @transform_1(%arg0: i32) -> (i32, i32, i32) {
    %c0_i32 = arith.constant 0 : i32
    %c0_i32_0 = arith.constant 0 : i32
    %c0_i32_1 = arith.constant 0 : i32
    %c0_i32_2 = arith.constant 0 : i32
    return %c0_i32, %c0_i32_0, %c0_i32_1 : i32, i32, i32
  }
  func.func @transform_2(%arg0: i32) -> (i32, i32, i32) {
    %c0_i32 = arith.constant 0 : i32
    %c0_i32_0 = arith.constant 0 : i32
    %c0_i32_1 = arith.constant 0 : i32
    %c0_i32_2 = arith.constant 0 : i32
    return %c0_i32, %c0_i32_0, %c0_i32_1 : i32, i32, i32
  }
  func.func @transform_3(%arg0: i32) -> (i32, i32) {
    %c0_i32 = arith.constant 0 : i32
    %c0_i32_0 = arith.constant 0 : i32
    %c0_i32_1 = arith.constant 0 : i32
    return %c0_i32, %c0_i32_0 : i32, i32
  }
  func.func @transform_4(%arg0: i32) -> (i32, i32) {
    %c0_i32 = arith.constant 0 : i32
    %c0_i32_0 = arith.constant 0 : i32
    %c0_i32_1 = arith.constant 0 : i32
    return %c0_i32, %c0_i32_0 : i32, i32
  }
  func.func @transform_5(%arg0: i32) -> (i32, i32, i32) {
    %c0_i32 = arith.constant 0 : i32
    %c0_i32_0 = arith.constant 0 : i32
    %c0_i32_1 = arith.constant 0 : i32
    return %arg0, %c0_i32, %c0_i32_0 : i32, i32, i32
  }
}

</mosaic_0001>

<bundles_post_ra>
// kernel: tpu_custom_call.1
= control target key start
LH: loop header
LB: loop body
LE: loop exit
PB: predicated region body
PF: predicated region fallthrough
CT: control target
= control target key end

     0   :  { %10 = vsyncpa [#allocation3], 0  ;;  %s3615_s0 = inlined_call_operand.vmem [shape: bf16[2,16,64], index: 0, kind: input, shape index: {}]   ;;  %s3616_s1 = inlined_call_operand.hbm [shape: bf16[3,64,128], index: 1, kind: input, shape index: {}]   ;;  %s3617_s2 = inlined_call_operand.vmem [shape: bf16[3,128,128], index: 2, kind: input, shape index: {}]   ;;  %s3618_s3 = inlined_call_operand.vmem [shape: f32[128,8], index: 3, kind: input, shape index: {}]   ;;  %s3619_s4 = inlined_call_operand.vmem [shape: f32[128,8], index: 4, kind: input, shape index: {}]   ;;  %s3620_s5 = inlined_call_operand.hbm [shape: f32[2,16,128], index: 5, kind: output, shape index: {}]  }
   0x1   :  { %11 = vsyncpa [#allocation4], 0  ;;  %s2695_s18 = smov [#allocation2]   ;;  %s2647_s22 = scalar_lea.hbm %s3616_s1, 1536 }
   0x2   :  { %s19_s19 = sshll.u32 %s2695_s18, 4  ;;  %p2648_p0 = scmp.ne.s32.totalorder %s3616_s1, %s2647_s22  ;;  %s20_s19 = int_to_ptr.vmem [resolvable:$true] %s19_s19 }
   0x3   :  { %p2651_p1 = scmp.lt.u32.totalorder %s2647_s22, %s3616_s1 }
   0x5   :  { %p2653_p2 = pnand %p2651_p1, %p2648_p0 }
   0x7   :  { %2656 = shalt.err (!%p2653_p2)
}
   0x8   :  { %s2657_s27 = scalar_lea.vmem %s20_s19, 1536  ;;  %p2662_p4 = scmp.lt.s32.totalorder %s20_s19, %s20_s19 }
   0x9   :  { %p2658_p3 = scmp.ne.s32.totalorder %s20_s19, %s2657_s27  ;;  %p2663_p5 = scmp.lt.s32.totalorder %s2657_s27, %s2657_s27 }
   0xb   :  { %p2664_p6 = por %p2663_p5, %p2662_p4 }
   0xd   :  { %p2665_p7 = pnand %p2664_p6, %p2658_p3 }
   0xf   :  { %2668 = shalt.err (!%p2665_p7)
}
  0x10   :  { %s2696_s28 = smov 64   ;;  %s2697_s29 = smov 4  }
  0x11   :  { %25 = dma.hbm_to_vmem [thread:$0]  %s3616_s1, 1536, %s20_s19, [#allocation3], %s2696_s28, %s2696_s28, %s2697_s29  }
  0x12   :  { %2691 = dma.done.wait [#allocation3], 1536  }
  0x13   :  { %2692 = vsyncadd [#allocation3], 4294965760  ;;  %v2605_v0 = vld [vmem:[#allocation2] sm:$0xff]   ;;  %v2606_v1 = vld [vmem:[#allocation2 + $0x8] sm:$0xff]   ;;  %vm82_vm0 = vcmask 523264   ;;  %v3621_v16 = vmov 0.0|0.0   ;;  %v229_v40 = vlaneseq }
  0x14   :  { %2366 = vmatprep.subr.bf16.mxu0 %v2605_v0  ;;  %v2608_v2 = vld [vmem:[#allocation2 + $0x40] sm:$0xff]   ;;  %v2607_v3 = vld [vmem:[#allocation2 + $0x10] sm:$0xff]   ;;  %v2611_v5 = vld [vmem:[#allocation2 + $0x48] sm:$0xff]   ;;  %vm3637_vm1 = vmmov 0   ;;  %v3623_v38 = vmov 0.0   ;;  %vm3634_vm8 = vcmask 1041409  }
  0x15   :  { %2367 = vmatpush3.bf16.msra.mxu0 %v2605_v0  ;;  %2378 = vmatprep.subr.bf16.mxu1 %v2608_v2  ;;  %v2610_v4 = vld [vmem:[%s3615_s0] sm:$0xff]   ;;  %v2609_v6 = vld [vmem:[#allocation2 + $0x18] sm:$0xff]   ;;  %v2614_v7 = vld [vmem:[#allocation2 + $0x50] sm:$0xff]   ;;  %v2834_v42 = vshrl.u32 %v229_v40, 7  ;;  %vm3632_vm9 = vcmask 1043459   ;;  %vm3631_vm10 = vcmask 1041408  }
  0x16   :  { %2368 = vmatprep.subr.bf16.mxu0 %v2606_v1  ;;  %2379 = vmatpush3.bf16.msra.mxu1 %v2608_v2  ;;  %v2616_v8 = vld [vmem:[#allocation2 + $0x58] sm:$0xff]   ;;  %v2613_v9 = vld [vmem:[#allocation2 + $0x20] sm:$0xff]   ;;  %v2612_v10 = vld [vmem:[%s3615_s0 + $0x8] sm:$0xff]   ;;  %s2705_s15 = smov 16   ;;  %s2706_s16 = smov 32   ;;  %vm3641_vm11 = vcmask 64512  }
  0x17   :  { %2374 = vmatprep.mubr.msk.bf16.mxu0 %vm82_vm0, %v2610_v4  ;;  %2380 = vmatprep.subr.bf16.mxu1 %v2611_v5  ;;  %v2615_v11 = vld [vmem:[#allocation2 + $0x28] sm:$0xff]   ;;  %v2617_v12 = vld [vmem:[#allocation2 + $0x30] sm:$0xff]   ;;  %v2618_v13 = vld [vmem:[#allocation2 + $0x38] sm:$0xff]   ;;  %vm3635_vm2 = vcmp.lt.s32.totalorder %v2834_v42, 1  ;;  %v232_v53 = vadd.s32 16, %v2834_v42  ;;  %vm3636_vm3 = vcmp.lt.s32.totalorder %v2834_v42, 7 }
  0x18   :  { %2386 = vmatprep.mubr.msk.bf16.mxu1 %vm82_vm0, %v2610_v4  ;;  %v437_v14 = vld [vmem:[%s3618_s3] sm:$0xff]  ;;  %v438_v15 = vld [vmem:[%s3618_s3 + $0x8] sm:$0xff]  ;;  %v439_v18 = vld [vmem:[%s3618_s3 + $0x10] sm:$0xff]  ;;  %s2707_s17 = smov 72   ;;  %s2708_s18 = smov 24   ;;  %vm3640_vm12 = vcmask 130048  }
  0x19   :  { %2369 = vmatpush3.bf16.msra.mxu0 %v2606_v1  ;;  %v2533_v17 = vpack.c.bf16 %v438_v15, %v437_v14  ;;  %v440_v19 = vld [vmem:[%s3618_s3 + $0x18] sm:$0xff]  ;;  %v441_v21 = vld [vmem:[%s3618_s3 + $0x20] sm:$0xff]  ;;  %v442_v22 = vld [vmem:[%s3618_s3 + $0x28] sm:$0xff]  ;;  %v252_v1 = vand.u32 15, %v232_v53  ;;  %s2709_s19 = smov 80   ;;  %s2710_s20 = smov 96  }
  0x1a   :  { %2370 = vmatprep.subr.bf16.mxu0 %v2607_v3  ;;  %2381 = vmatpush3.bf16.msra.mxu1 %v2611_v5  ;;  %v2536_v20 = vpack.c.bf16 %v440_v19, %v439_v18  ;;  %v2539_v23 = vpack.c.bf16 %v442_v22, %v441_v21  ;;  %v443_v24 = vld [vmem:[%s3618_s3 + $0x30] sm:$0xff]  ;;  %v444_v25 = vld [vmem:[%s3618_s3 + $0x38] sm:$0xff]  ;;  %v445_v27 = vld [vmem:[%s3618_s3 + $0x40] sm:$0xff]  ;;  %v238_v5 = vand.u32 15, %v2834_v42  ;;  %s2711_s21 = smov 40   ;;  %s2712_s22 = smov 48  }
  0x1b   :  { %2382 = vmatprep.subr.bf16.mxu1 %v2614_v7  ;;  %v2542_v26 = vpack.c.bf16 %v444_v25, %v443_v24  ;;  %v446_v28 = vld [vmem:[%s3618_s3 + $0x48] sm:$0xff]  ;;  %v447_v30 = vld [vmem:[%s3618_s3 + $0x50] sm:$0xff]  ;;  %v448_v31 = vld [vmem:[%s3618_s3 + $0x58] sm:$0xff]  ;;  %vm2858_vm4 = vcmp.gt.s32.totalorder %v252_v1, 0  ;;  %s2713_s23 = smov 88   ;;  %s2714_s24 = smov 104  }
  0x1c   :  { %v2545_v29 = vpack.c.bf16 %v446_v28, %v445_v27  ;;  %v2548_v32 = vpack.c.bf16 %v448_v31, %v447_v30  ;;  %v449_v33 = vld [vmem:[%s3618_s3 + $0x60] sm:$0xff]  ;;  %v450_v34 = vld [vmem:[%s3618_s3 + $0x68] sm:$0xff]  ;;  %v451_v35 = vld [vmem:[%s3618_s3 + $0x70] sm:$0xff]  ;;  %vm2862_vm5 = vcmp.gt.s32.totalorder %v238_v5, 0  ;;  %s2715_s25 = smov 112   ;;  %s2716_s26 = smov 56  }
  0x1d   :  { %2371 = vmatpush3.bf16.msra.mxu0 %v2607_v3  ;;  %v2551_v36 = vpack.c.bf16 %v450_v34, %v449_v33  ;;  %v452_v37 = vld [vmem:[%s3618_s3 + $0x78] sm:$0xff]  ;;  %v233_v3 = vadd.s32 24, %v2834_v42  ;;  %s2704_s3 = smov 8   ;;  %s2717_s13 = smov 120   ;;  %vm3639_vm13 = vcmask 195584   ;;  %vm779_vm14 = vcmask 261120  }
  0x1e   :  { %2372 = vmatprep.subr.bf16.mxu0 %v2609_v6  ;;  %2383 = vmatpush3.bf16.msra.mxu1 %v2614_v7  ;;  %v2554_v39 = vpack.c.bf16 %v452_v37, %v451_v35  ;;  %vm782_vm15 = vcmask 326656  }
  0x1f   :  { %2384 = vmatprep.subr.bf16.mxu1 %v2616_v8 }
  0x21   :  { %2373 = vmatpush3.bf16.msra.mxu0 %v2609_v6  ;;  %v231_v6 = vadd.s32 8, %v2834_v42 }
  0x22   :  { %2390 = vmatprep.subr.bf16.mxu0 %v2613_v9  ;;  %2385 = vmatpush3.bf16.msra.mxu1 %v2616_v8  ;;  %v259_v8 = vand.u32 15, %v233_v3 }
  0x23   :  { %2532 = vmatprep.subr.bf16.mxu1 %v3621_v16 }
  0x24   :  { %2375 = vmatmul.mubr.msk.bf16.vlgmr.msra.gmra.mrb[0].mxu0 %vm82_vm0, %v2612_v10  ;;  %vm2870_vm6 = vcmp.lt.s32.totalorder %v259_v8, 15 }
  0x25   :  { %2391 = vmatpush3.bf16.msra.mxu0 %v2613_v9  ;;  %2398 = vmatprep.mubr.msk.bf16.mxu0 %vm82_vm0, %v2610_v4 }
  0x26   :  { %2392 = vmatprep.subr.bf16.mxu0 %v2615_v11  ;;  %2387 = vmatmul.mubr.msk.bf16.vlgmr.msra.gmra.mrb[0].mxu1 %vm82_vm0, %v2612_v10 }
  0x27   :  { %2534 = vmatpush3.bf16.msra.mxu1 %v2533_v17  ;;  %2434 = vmatprep.mubr.msk.f32.mxu1 %vm3637_vm1, %v3623_v38  ;;  %vm3645_vm1 = vcmask 785408  }
  0x28   :  { %2535 = vmatprep.subr.bf16.mxu1 %v3621_v16 }
  0x29   :  { %2393 = vmatpush3.bf16.msra.mxu0 %v2615_v11 }
  0x2a   :  { %2394 = vmatprep.subr.bf16.mxu0 %v2617_v12 }
  0x2b   :  { %2537 = vmatpush3.bf16.msra.mxu1 %v2536_v20  ;;  %v3654_v20 = vmov 0 }
  0x2c   :  { %2538 = vmatprep.subr.bf16.mxu1 %v3621_v16 }
  0x2d   :  { %2395 = vmatpush3.bf16.msra.mxu0 %v2617_v12 }
  0x2e   :  { %2396 = vmatprep.subr.bf16.mxu0 %v2618_v13 }
  0x2f   :  { %2540 = vmatpush3.bf16.msra.mxu1 %v2539_v23 }
  0x30   :  { %2541 = vmatprep.subr.bf16.mxu1 %v3621_v16 }
  0x31   :  { %2397 = vmatpush3.bf16.msra.mxu0 %v2618_v13 }
  0x33   :  { %2543 = vmatpush3.bf16.msra.mxu1 %v2542_v26 }
  0x34   :  { %2399 = vmatmul.mubr.msk.bf16.vlgmr.msra.gmra.mrb[4].mxu0 %vm82_vm0, %v2612_v10  ;;  %2544 = vmatprep.subr.bf16.mxu1 %v3621_v16  ;;  %v245_v10 = vand.u32 15, %v231_v6 }
  0x36   :  { %vm2874_vm7 = vcmp.lt.s32.totalorder %v245_v10, 15 }
  0x37   :  { %2546 = vmatpush3.bf16.msra.mxu1 %v2545_v29  ;;  %v3655_v20 = vsel %vm2874_vm7, 4294967295, %v3654_v20 }
  0x38   :  { %2547 = vmatprep.subr.bf16.mxu1 %v3621_v16  ;;  %3656 = vst [vmem:[#allocation8_spill] sm:$0xff] %v3655_v20 }
  0x3b   :  { %2549 = vmatpush3.bf16.msra.mxu1 %v2548_v32 }
  0x3c   :  { %2550 = vmatprep.subr.bf16.mxu1 %v3621_v16 }
  0x3f   :  { %2552 = vmatpush3.bf16.msra.mxu1 %v2551_v36 }
  0x40   :  { %2553 = vmatprep.subr.bf16.mxu1 %v3621_v16 }
  0x43   :  { %2555 = vmatpush3.bf16.msra.mxu1 %v2554_v39 }
  0xf7   :  { %v2376_v41 = vpop.f32.mrb[0].mxu0 }
  0xf8   :  { %v288_v43 = vrot.slane %v2376_v41, 7  ;;  %v123_v44 = vpop.f32.mrb[1].mxu0 }
  0xf9   :  { %v286_v45 = vrot.slane %v123_v44, 7  ;;  %v2377_v46 = vpop.f32.mrb[2].mxu0  ;;  %v2388_v49 = vpop.f32.mrb[0].mxu1 }
  0xfa   :  { %v289_v47 = vrot.slane %v2377_v46, 7  ;;  %v126_v48 = vpop.f32.mrb[3].mxu0  ;;  %v305_v51 = vrot.slane %v2388_v49, 1  ;;  %v214_v52 = vpop.f32.mrb[1].mxu1 }
  0xfb   :  { %v287_v50 = vrot.slane %v126_v48, 7  ;;  %v303_v54 = vrot.slane %v214_v52, 1  ;;  %v2389_v55 = vpop.f32.mrb[2].mxu1 }
  0xfc   :  { %v294_v56 = vsel %vm3635_vm2, %v289_v47, %v286_v45  ;;  %v291_v57 = vsel %vm3635_vm2, %v288_v43, %v289_v47  ;;  %v306_v58 = vrot.slane %v2389_v55, 1  ;;  %v217_v59 = vpop.f32.mrb[3].mxu1 }
  0xfd   :  { %v292_v60 = vsel %vm3635_vm2, %v287_v50, %v288_v43  ;;  %v293_v61 = vsel %vm3635_vm2, %v286_v45, %v287_v50  ;;  %v304_v62 = vrot.slane %v217_v59, 1  ;;  %v295_v14 = vsel %vm2862_vm5, %v294_v56, 0.0 }
  0xfe   :  { %v308_v63 = vsel %vm3636_vm3, %v305_v51, %v306_v58  ;;  %v311_v0 = vsel %vm3636_vm3, %v306_v58, %v303_v54  ;;  %v297_v11 = vsel %vm2858_vm4, %v292_v60, 0.0  ;;  %vm3638_vm2 = vcmask 654336  }
  0xff   :  { %v310_v2 = vsel %vm3636_vm3, %v303_v54, %v304_v62  ;;  %v309_v4 = vsel %vm3636_vm3, %v304_v62, %v305_v51  ;;  %v315_v25 = vsel %vm2870_vm6, %v311_v0, 0.0  ;;  %vm3646_vm3 = vcmask 719872  }
 0x100   :  { %v313_v28 = vsel %vm2874_vm7, %v309_v4, 0.0 }
 0x107   :  { %v2400_v12 = vpop.f32.mrb[4].mxu0 }
 0x108   :  { %v383_v13 = vadd.f32 %v2400_v12, %v297_v11  ;;  %v374_v15 = vpop.f32.mrb[5].mxu0  ;;  %v2701_v12 = vmov 1966171168  }
 0x109   :  { %v375_v18 = vadd.f32 %v374_v15, %v295_v14  ;;  %v2401_v19 = vpop.f32.mrb[6].mxu0  ;;  %v2702_v15 = vmov 1983009808  }
 0x10a   :  { %v2878_v21 = vadd.f32 %v383_v13, %v308_v63  ;;  %v386_v22 = vadd.f32 %v2401_v19, %v291_v57  ;;  %v377_v23 = vpop.f32.mrb[7].mxu0  ;;  %v533_v13 = vunpack.c.l.s4 %v2701_v12 }
 0x10b   :  { %v2880_v24 = vadd.f32 %v375_v18, %v310_v2  ;;  %v378_v26 = vadd.f32 %v377_v23, %v293_v61  ;;  %v568_v18 = vunpack.c.l.s4 %v2702_v15 }
 0x10c   :  { %v2884_v27 = vadd.f32 %v386_v22, %v315_v25  ;;  %v409_v30 = vmul.f32 %v2878_v21, %v2878_v21  ;;  %v534_v14 = vunpack.c.0.s8 %v533_v13  ;;  %v2703_v22 = vmov 1934713408  }
 0x10d   :  { %v2888_v29 = vadd.f32 %v378_v26, %v313_v28  ;;  %v407_v33 = vmul.f32 %v2880_v24, %v2880_v24  ;;  %v583_v23 = vunpack.c.l.s4 %v2703_v22  ;;  %v569_v26 = vunpack.c.0.s8 %v568_v18 }
 0x10e   :  { %v400_v31 = vadd.f32 %v2884_v27, %v2878_v21  ;;  %v410_v32 = vmul.f32 %v2884_v27, %v2884_v27  ;;  %v2906_v19 = vsub.s32 %v534_v14, %v2834_v42 }
 0x10f   :  { %v393_v34 = vadd.f32 %v2888_v29, %v2880_v24  ;;  %v408_v35 = vmul.f32 %v2888_v29, %v2888_v29 }
 0x110   :  { %v401_v36 = vrot.slane %v400_v31, 4  ;;  %v418_v37 = vadd.f32 %v410_v32, %v409_v30  ;;  %3657 = vst [vmem:[#allocation9_spill] sm:$0xff] %v2906_v19  ;;  %v2910_v30 = vsub.s32 0, %v2834_v42 }
 0x111   :  { %v394_v39 = vrot.slane %v393_v34, 4  ;;  %v411_v40 = vadd.f32 %v408_v35, %v407_v33 }
 0x112   :  { %v402_v41 = vadd.f32 %v401_v36, %v400_v31  ;;  %v419_v43 = vrot.slane %v418_v37, 4  ;;  %v584_v31 = vunpack.c.0.s8 %v583_v23 }
 0x113   :  { %v395_v44 = vadd.f32 %v394_v39, %v393_v34  ;;  %v412_v45 = vrot.slane %v411_v40, 4  ;;  %v2914_v34 = vsub.s32 %v569_v26, %v2834_v42 }
 0x114   :  { %v403_v46 = vrot.slane %v402_v41, 2  ;;  %v420_v47 = vadd.f32 %v419_v43, %v418_v37  ;;  %v2918_v37 = vsub.s32 %v584_v31, %v2834_v42 }
 0x115   :  { %v396_v48 = vrot.slane %v395_v44, 2  ;;  %v413_v49 = vadd.f32 %v412_v45, %v411_v40  ;;  %3658 = vst [vmem:[#allocation10_spill] sm:$0xff] %v2914_v34 }
 0x116   :  { %v404_v50 = vadd.f32 %v403_v46, %v402_v41  ;;  %v421_v51 = vrot.slane %v420_v47, 2  ;;  %3659 = vst [vmem:[#allocation11_spill] sm:$0xff] %v2918_v37 }
 0x117   :  { %v397_v52 = vadd.f32 %v396_v48, %v395_v44  ;;  %v414_v53 = vrot.slane %v413_v49, 2 }
 0x118   :  { %v405_v54 = vrot.slane %v404_v50, 1  ;;  %v422_v55 = vadd.f32 %v421_v51, %v420_v47 }
 0x119   :  { %v398_v56 = vrot.slane %v397_v52, 1  ;;  %v415_v57 = vadd.f32 %v414_v53, %v413_v49 }
 0x11a   :  { %v423_v58 = vrot.slane %v422_v55, 1  ;;  %v406_v60 = vadd.f32 %v405_v54, %v404_v50 }
 0x11b   :  { %v399_v59 = vadd.f32 %v398_v56, %v397_v52  ;;  %v416_v61 = vrot.slane %v415_v57, 1 }
 0x11c   :  { %v424_v62 = vadd.f32 %v423_v58, %v422_v55 }
 0x11d   :  { %v417_v63 = vadd.f32 %v416_v61, %v415_v57  ;;  %v428_v0 = vsel %vm3634_vm8, %v406_v60, %v399_v59  ;;  %vm3647_vm8 = vcmask 588800  }
 0x11f   :  { %v433_v1 = vsel %vm3632_vm9, %v424_v62, %v417_v63  ;;  %vm788_vm9 = vcmask 457728  }
 0x120   :  { %v436_v2 = vsel %vm3631_vm10, %v428_v0, %v433_v1  ;;  %vm785_vm10 = vcmask 392192  }
 0x121   :  { %2435 = vmatmul.mubr.f32.vlgmr.msra.gmra.mrb[4].mxu1 %v436_v2 }
 0x1f4   :  { %v519_v3 = vpop.f32.mrb[4].mxu1 }
 0x1f5   :  { %v523_v4 = vmul.f32 0.00390625, %v519_v3  ;;  %v2436_v5 = vpop.f32.mrb[5].mxu1 }
 0x1f7   :  { %v524_v6 = vmul.f32 %v523_v4, %v523_v4  ;;  %v814_v43 = vsub.f32 0.0, %v523_v4 }
 0x1f9   :  { %v526_v8 = vrot.slane %v524_v6, 6 }
 0x1fb   :  { %v528_v10 = vsub.f32 %v523_v4, %v526_v8 }
 0x1fd   :  { %v529_v11 = vadd.f32 1e-05, %v528_v10 }
 0x1ff   :  { %2643 = vrsqrt.f32 %v529_v11 }
 0x209   :  { %v2644_v25 = vpop.eup %2643 }
 0x20a   :  { %v538_v28 = vrot.slane %v2644_v25, %v2906_v19  ;;  %v815_v39 = vrot.slane %v2644_v25, 2 }
 0x20c   :  { %v546_v32 = vrot.slane %v538_v28, %v2906_v19  ;;  %v539_v33 = vcombine.high %v538_v28, %v538_v28  ;;  %v817_v46 = vmul.f32 %v815_v39, %v814_v43 }
 0x20e   :  { %v554_v35 = vcombine.high %v546_v32, %v546_v32  ;;  %v553_v36 = vrot.slane %v539_v33, %v2906_v19  ;;  %v825_v52 = vrot.slane %v817_v46, %v2906_v19 }
 0x210   :  { %v559_v40 = vrot.slane %v554_v35, %v2910_v30  ;;  %v555_v41 = vcombine.high %v553_v36, %v553_v36  ;;  %v833_v57 = vrot.slane %v825_v52, %v2906_v19  ;;  %v826_v61 = vcombine.high %v825_v52, %v825_v52  ;;  %v2621_v52 = vld [vmem:[%s3617_s2 + $0x8] sm:$0xff]  }
 0x212   :  { %v573_v44 = vrot.slane %v559_v40, %v2914_v34  ;;  %v563_v45 = vrot.slane %v555_v41, %v2910_v30  ;;  %v566_v49 = vcombine.high %v559_v40, %v3623_v38  ;;  %v844_v60 = vrot.slane %v833_v57, %v2910_v30 }
 0x213   :  { %v840_v2 = vrot.slane %v826_v61, %v2906_v19  ;;  %v2625_v61 = vld [vmem:[%s3617_s2 + $0x18] sm:$0xff]  }
 0x214   :  { %v2924_v47 = vrot.slane %v573_v44, %v2918_v37  ;;  %v581_v48 = vcombine.high %v573_v44, %v3623_v38  ;;  %v622_v51 = vrot.slane %v563_v45, %v2914_v34  ;;  %v580_v54 = vrot.slane %v566_v49, %v2914_v34 }
 0x215   :  { %v615_v59 = vcombine.high %v563_v45, %v3623_v38  ;;  %v858_v0 = vrot.slane %v844_v60, %v2914_v34  ;;  %v848_v5 = vrot.slane %v840_v2, %v2910_v30  ;;  %v851_v22 = vcombine.high %v844_v60, %v3623_v38  ;;  %v2619_v45 = vld [vmem:[%s3617_s2] sm:$0xff]   ;;  %v2629_v2 = vld [vmem:[%s3617_s2 + $0x28] sm:$0xff]  }
 0x216   :  { %722 = vrot.lane.b32.xlu1 %v2924_v47, %s2696_s28  ;;  %v611_v50 = vcombine.high %v2924_v47, %v3623_v38  ;;  %v595_v53 = vrot.slane %v581_v48, %v2918_v37  ;;  %v2939_v55 = vrot.slane %v622_v51, %v2918_v37  ;;  %v603_v56 = vrot.slane %v580_v54, %v2918_v37 }
 0x217   :  { %v629_v63 = vrot.slane %v615_v59, %v2914_v34  ;;  %v2961_v3 = vrot.slane %v858_v0, %v2918_v37  ;;  %v630_v4 = vcombine.high %v622_v51, %v3623_v38  ;;  %v907_v8 = vrot.slane %v848_v5, %v2914_v34  ;;  %2437 = vmatprep.subr.bf16.mxu0 %v2619_v45  ;;  %v2620_v51 = vld [vmem:[%s3617_s2 + $0x80] sm:$0xff]   ;;  %v2624_v59 = vld [vmem:[%s3617_s2 + $0x90] sm:$0xff]  }
 0x218   :  { %666 = vrot.lane.b32.xlu0 %v611_v50, %s2704_s3  ;;  %v660_v58 = vcombine.high %v2939_v55, %v3623_v38  ;;  %v612_v62 = vcombine.high %v595_v53, %v3623_v38  ;;  %v866_v12 = vcombine.high %v858_v0, %v3623_v38  ;;  %v613_v15 = vcombine.high %v603_v56, %v3623_v38 }
 0x219   :  { %v652_v1 = vrot.slane %v629_v63, %v2918_v37  ;;  %v644_v6 = vrot.slane %v630_v4, %v2918_v37  ;;  %v2974_v10 = vrot.slane %v907_v8, %v2918_v37  ;;  %v896_v11 = vcombine.high %v2961_v3, %v3623_v38  ;;  %2438 = vmatpush3.bf16.msra.mxu0 %v2619_v45  ;;  %v2630_v4 = vld [vmem:[%s3617_s2 + $0xa8] sm:$0xff]  }
 0x21a   :  { %674 = vrot.lane.b32.xlu1 %v595_v53, %s2705_s15  ;;  %v880_v13 = vrot.slane %v866_v12, %v2918_v37  ;;  %v596_v18 = vcombine.high %v580_v54, %v3623_v38  ;;  %v915_v25 = vcombine.high %v907_v8, %v3623_v38  ;;  %v865_v28 = vrot.slane %v851_v22, %v2914_v34  ;;  %v2632_v8 = vld [vmem:[%s3617_s2 + $0xb0] sm:$0xff]   ;;  %v2634_v12 = vld [vmem:[%s3617_s2 + $0xb8] sm:$0xff]  }
 0x21b   :  { %v661_v14 = vcombine.high %v644_v6, %v3623_v38  ;;  %v945_v23 = vcombine.high %v2974_v10, %v3623_v38  ;;  %v662_v33 = vcombine.high %v652_v1, %v3623_v38  ;;  %v645_v35 = vcombine.high %v629_v63, %v3623_v38  ;;  %2457 = vmatprep.subr.bf16.mxu1 %v2620_v51  ;;  %v2627_v63 = vld [vmem:[%s3617_s2 + $0x20] sm:$0xff]  }
 0x21c   :  { %724 = vrot.lane.b32.xlu0 %v2939_v55, %s2696_s28  ;;  %v610_v26 = vrot.slane %v596_v18, %v2918_v37  ;;  %v929_v31 = vrot.slane %v915_v25, %v2918_v37  ;;  %v888_v32 = vrot.slane %v865_v28, %v2918_v37  ;;  %v900_v36 = vcombine.high %v848_v5, %v3623_v38 }
 0x21d   :  { %v659_v39 = vrot.slane %v645_v35, %v2918_v37  ;;  %v897_v43 = vcombine.high %v880_v13, %v3623_v38  ;;  %v881_v48 = vcombine.high %v865_v28, %v3623_v38  ;;  %2458 = vmatpush3.bf16.msra.mxu1 %v2620_v51  ;;  %2439 = vmatprep.subr.bf16.mxu0 %v2621_v52 }
 0x21e   :  { %690 = vrot.lane.b32.xlu1 %v603_v56, %s2706_s16  ;;  %v914_v40 = vrot.slane %v900_v36, %v2914_v34  ;;  %v614_v44 = vcombine.high %v610_v26, %v3623_v38  ;;  %v898_v46 = vcombine.high %v888_v32, %v3623_v38  ;;  %v946_v49 = vcombine.high %v929_v31, %v3623_v38 }
 0x21f   :  { %v663_v54 = vcombine.high %v659_v39, %v3623_v38  ;;  %2440 = vmatpush3.bf16.msra.mxu0 %v2621_v52 }
 0x220   :  { %668 = vrot.lane.b32.xlu0 %v660_v58, %s2704_s3  ;;  %v937_v41 = vrot.slane %v914_v40, %v2918_v37 }
 0x222   :  { %728 = vrot.lane.b32.xlu1 %v611_v50, %s2707_s17  ;;  %v895_v50 = vrot.slane %v881_v48, %v2918_v37  ;;  %v947_v57 = vcombine.high %v937_v41, %v3623_v38 }
 0x224   :  { %682 = vrot.lane.b32.xlu0 %v612_v62, %s2708_s18  ;;  %v899_v0 = vcombine.high %v895_v50, %v3623_v38 }
 0x226   :  { %734 = vrot.lane.b32.xlu1 %v595_v53, %s2709_s19  ;;  %v2622_v53 = vld [vmem:[%s3617_s2 + $0x88] sm:$0xff]  }
 0x227   :  { %2459 = vmatprep.subr.bf16.mxu1 %v2622_v53 }
 0x228   :  { %692 = vrot.lane.b32.xlu0 %v652_v1, %s2706_s16  ;;  %2460 = vmatpush3.bf16.msra.mxu1 %v2622_v53 }
 0x229   :  { %2461 = vmatprep.subr.bf16.mxu1 %v2624_v59 }
 0x22a   :  { %1007 = vrot.lane.b32.xlu1 %v2961_v3, %s2696_s28 }
 0x22c   :  { %730 = vrot.lane.b32.xlu0 %v660_v58, %s2707_s17  ;;  %v930_v58 = vcombine.high %v914_v40, %v3623_v38  ;;  %2462 = vmatpush3.bf16.msra.mxu1 %v2624_v59 }
 0x22e   :  { %746 = vrot.lane.b32.xlu1 %v603_v56, %s2710_s20  ;;  %v2623_v56 = vld [vmem:[%s3617_s2 + $0x10] sm:$0xff]   ;;  %v944_v60 = vrot.slane %v930_v58, %v2918_v37 }
 0x22f   :  { %2441 = vmatprep.subr.bf16.mxu0 %v2623_v56 }
 0x230   :  { %736 = vrot.lane.b32.xlu0 %v644_v6, %s2709_s19  ;;  %2442 = vmatpush3.bf16.msra.mxu0 %v2623_v56  ;;  %v948_v5 = vcombine.high %v944_v60, %v3623_v38 }
 0x231   :  { %2443 = vmatprep.subr.bf16.mxu0 %v2625_v61 }
 0x232   :  { %676 = vrot.lane.b32.xlu1 %v644_v6, %s2705_s15  ;;  %v2631_v6 = vld [vmem:[%s3617_s2 + $0x30] sm:$0xff]  }
 0x234   :  { %1009 = vrot.lane.b32.xlu0 %v2974_v10, %s2696_s28  ;;  %2444 = vmatpush3.bf16.msra.mxu0 %v2625_v61 }
 0x235   :  { %2445 = vmatprep.subr.bf16.mxu0 %v2627_v63 }
 0x236   :  { %951 = vrot.lane.b32.xlu1 %v896_v11, %s2704_s3 }
 0x238   :  { %748 = vrot.lane.b32.xlu0 %v652_v1, %s2710_s20  ;;  %2446 = vmatpush3.bf16.msra.mxu0 %v2627_v63  ;;  %v2628_v1 = vld [vmem:[%s3617_s2 + $0xa0] sm:$0xff]  }
 0x239   :  { %2447 = vmatprep.subr.bf16.mxu0 %v2629_v2 }
 0x23a   :  { %959 = vrot.lane.b32.xlu1 %v880_v13, %s2705_s15 }
 0x23c   :  { %684 = vrot.lane.b32.xlu0 %v661_v14, %s2708_s18  ;;  %2448 = vmatpush3.bf16.msra.mxu0 %v2629_v2 }
 0x23d   :  { %2449 = vmatprep.subr.bf16.mxu0 %v2631_v6 }
 0x23e   :  { %698 = vrot.lane.b32.xlu1 %v613_v15, %s2711_s21 }
 0x240   :  { %953 = vrot.lane.b32.xlu0 %v945_v23, %s2704_s3  ;;  %2450 = vmatpush3.bf16.msra.mxu0 %v2631_v6 }
 0x242   :  { %706 = vrot.lane.b32.xlu1 %v610_v26, %s2712_s22 }
 0x244   :  { %961 = vrot.lane.b32.xlu0 %v929_v31, %s2705_s15 }
 0x246   :  { %975 = vrot.lane.b32.xlu1 %v888_v32, %s2706_s16 }
 0x248   :  { %700 = vrot.lane.b32.xlu0 %v662_v33, %s2711_s21 }
 0x24a   :  { %740 = vrot.lane.b32.xlu1 %v612_v62, %s2713_s23  ;;  %v2626_v62 = vld [vmem:[%s3617_s2 + $0x98] sm:$0xff]  }
 0x24b   :  { %2463 = vmatprep.subr.bf16.mxu1 %v2626_v62 }
 0x24c   :  { %708 = vrot.lane.b32.xlu0 %v659_v39, %s2712_s22  ;;  %2464 = vmatpush3.bf16.msra.mxu1 %v2626_v62 }
 0x24d   :  { %2465 = vmatprep.subr.bf16.mxu1 %v2628_v1 }
 0x24e   :  { %1013 = vrot.lane.b32.xlu1 %v896_v11, %s2707_s17  ;;  %v2633_v11 = vld [vmem:[%s3617_s2 + $0x38] sm:$0xff]  }
 0x24f   :  { %2451 = vmatprep.subr.bf16.mxu0 %v2633_v11 }
 0x250   :  { %977 = vrot.lane.b32.xlu0 %v937_v41, %s2706_s16  ;;  %2466 = vmatpush3.bf16.msra.mxu1 %v2628_v1 }
 0x251   :  { %2467 = vmatprep.subr.bf16.mxu1 %v2630_v4  ;;  %2452 = vmatpush3.bf16.msra.mxu0 %v2633_v11 }
 0x252   :  { %1019 = vrot.lane.b32.xlu1 %v880_v13, %s2709_s19 }
 0x254   :  { %742 = vrot.lane.b32.xlu0 %v661_v14, %s2713_s23  ;;  %2468 = vmatpush3.bf16.msra.mxu1 %v2630_v4  ;;  %v3106_v14 = vld [vmem:[%s3617_s2 + $0x40] sm:$0xff]  }
 0x255   :  { %2469 = vmatprep.subr.bf16.mxu1 %v2632_v8  ;;  %2477 = vmatprep.subr.bf16.mxu0 %v3106_v14 }
 0x256   :  { %752 = vrot.lane.b32.xlu1 %v613_v15, %s2714_s24 }
 0x258   :  { %1015 = vrot.lane.b32.xlu0 %v945_v23, %s2707_s17  ;;  %2470 = vmatpush3.bf16.msra.mxu1 %v2632_v8 }
 0x259   :  { %2471 = vmatprep.subr.bf16.mxu1 %v2634_v12 }
 0x25a   :  { %758 = vrot.lane.b32.xlu1 %v610_v26, %s2715_s25 }
 0x25c   :  { %1021 = vrot.lane.b32.xlu0 %v929_v31, %s2709_s19  ;;  %2472 = vmatpush3.bf16.msra.mxu1 %v2634_v12 }
 0x25d   :  { %2556 = vmatprep.subr.bf16.mxu1 %v3621_v16 }
 0x25e   :  { %1031 = vrot.lane.b32.xlu1 %v888_v32, %s2710_s20 }
 0x260   :  { %754 = vrot.lane.b32.xlu0 %v662_v33, %s2714_s24 }
 0x262   :  { %967 = vrot.lane.b32.xlu1 %v897_v43, %s2708_s18 }
 0x264   :  { %760 = vrot.lane.b32.xlu0 %v659_v39, %s2715_s25 }
 0x266   :  { %714 = vrot.lane.b32.xlu1 %v614_v44, %s2716_s26 }
 0x268   :  { %1033 = vrot.lane.b32.xlu0 %v937_v41, %s2710_s20 }
 0x26a   :  { %983 = vrot.lane.b32.xlu1 %v898_v46, %s2711_s21 }
 0x26c   :  { %969 = vrot.lane.b32.xlu0 %v946_v49, %s2708_s18 }
 0x26e   :  { %991 = vrot.lane.b32.xlu1 %v895_v50, %s2712_s22 }
 0x270   :  { %716 = vrot.lane.b32.xlu0 %v663_v54, %s2716_s26 }
 0x272   :  { %1025 = vrot.lane.b32.xlu1 %v897_v43, %s2713_s23 }
 0x274   :  { %985 = vrot.lane.b32.xlu0 %v947_v57, %s2711_s21 }
 0x276   :  { %764 = vrot.lane.b32.xlu1 %v614_v44, %s2717_s13 }
 0x278   :  { %993 = vrot.lane.b32.xlu0 %v944_v60, %s2712_s22 }
 0x27a   :  { %1037 = vrot.lane.b32.xlu1 %v898_v46, %s2714_s24 }
 0x27c   :  { %1027 = vrot.lane.b32.xlu0 %v946_v49, %s2713_s23 }
 0x27e   :  { %999 = vrot.lane.b32.xlu1 %v899_v0, %s2716_s26 }
 0x280   :  { %766 = vrot.lane.b32.xlu0 %v663_v54, %s2717_s13 }
 0x282   :  { %1039 = vrot.lane.b32.xlu1 %v947_v57, %s2714_s24 }
 0x284   :  { %1001 = vrot.lane.b32.xlu0 %v948_v5, %s2716_s26 }
 0x286   :  { %1045 = vrot.lane.b32.xlu1 %v944_v60, %s2715_s25 }
 0x288   :  { %v3100_v13 = vpop.permute.xlu1 %722  ;;  %1043 = vrot.lane.b32.xlu0 %v895_v50, %s2715_s25 }
 0x28a   :  { %v667_v15 = vpop.permute.xlu0 %666  ;;  %1051 = vrot.lane.b32.xlu1 %v948_v5, %s2717_s13 }
 0x28b   :  { %v771_v6 = vsel %vm3641_vm11, %v2924_v47, %v667_v15 }
 0x28c   :  { %v675_v18 = vpop.permute.xlu1 %674  ;;  %1049 = vrot.lane.b32.xlu0 %v899_v0, %s2717_s13 }
 0x28d   :  { %v774_v12 = vsel %vm3640_vm12, %v771_v6, %v675_v18 }
 0x28e   :  { %v3112_v22 = vpop.permute.xlu0 %724 }
 0x290   :  { %v691_v23 = vpop.permute.xlu1 %690 }
 0x292   :  { %v669_v25 = vpop.permute.xlu0 %668 }
 0x293   :  { %v772_v16 = vsel %vm3641_vm11, %v2939_v55, %v669_v25 }
 0x294   :  { %v3114_v26 = vpop.permute.xlu1 %728 }
 0x296   :  { %v683_v28 = vpop.permute.xlu0 %682 }
 0x297   :  { %v777_v38 = vsel %vm3639_vm13, %v774_v12, %v683_v28 }
 0x298   :  { %v3116_v31 = vpop.permute.xlu1 %734  ;;  %v780_v15 = vsel %vm779_vm14, %v777_v38, %v691_v23 }
 0x29a   :  { %v693_v32 = vpop.permute.xlu0 %692 }
 0x29c   :  { %v3118_v33 = vpop.permute.xlu1 %1007 }
 0x29e   :  { %v3120_v35 = vpop.permute.xlu0 %730 }
 0x2a0   :  { %v3122_v36 = vpop.permute.xlu1 %746 }
 0x2a2   :  { %v3124_v39 = vpop.permute.xlu0 %736 }
 0x2a4   :  { %v677_v40 = vpop.permute.xlu1 %676 }
 0x2a5   :  { %v775_v37 = vsel %vm3640_vm12, %v772_v16, %v677_v40 }
 0x2a6   :  { %v3126_v41 = vpop.permute.xlu0 %1009 }
 0x2a8   :  { %v952_v43 = vpop.permute.xlu1 %951 }
 0x2aa   :  { %v3128_v44 = vpop.permute.xlu0 %748 }
 0x2ac   :  { %v960_v45 = vpop.permute.xlu1 %959 }
 0x2ae   :  { %v685_v46 = vpop.permute.xlu0 %684 }
 0x2af   :  { %v778_v19 = vsel %vm3639_vm13, %v775_v37, %v685_v46 }
 0x2b0   :  { %v699_v48 = vpop.permute.xlu1 %698  ;;  %v781_v18 = vsel %vm779_vm14, %v778_v19, %v693_v32 }
 0x2b1   :  { %v783_v20 = vsel %vm782_vm15, %v780_v15, %v699_v48  ;;  %v1055_v48 = vsel %vm3641_vm11, %v2961_v3, %v952_v43 }
 0x2b2   :  { %v3130_v49 = vpop.permute.xlu0 %953 }
 0x2b4   :  { %v707_v50 = vpop.permute.xlu1 %706 }
 0x2b5   :  { %v786_v55 = vsel %vm785_vm10, %v783_v20, %v707_v50 }
 0x2b6   :  { %v3132_v51 = vpop.permute.xlu0 %961 }
 0x2b8   :  { %v976_v52 = vpop.permute.xlu1 %975 }
 0x2ba   :  { %v701_v53 = vpop.permute.xlu0 %700 }
 0x2bb   :  { %v784_v25 = vsel %vm782_vm15, %v781_v18, %v701_v53  ;;  %v1057_v53 = vsel %vm3640_vm12, %v1055_v48, %v960_v45 }
 0x2bc   :  { %v741_v54 = vpop.permute.xlu1 %740 }
 0x2be   :  { %v709_v56 = vpop.permute.xlu0 %708 }
 0x2bf   :  { %v787_v16 = vsel %vm785_vm10, %v784_v25, %v709_v56 }
 0x2c0   :  { %v3134_v57 = vpop.permute.xlu1 %1013 }
 0x2c2   :  { %v3136_v58 = vpop.permute.xlu0 %977 }
 0x2c4   :  { %v3138_v59 = vpop.permute.xlu1 %1019 }
 0x2c6   :  { %v743_v60 = vpop.permute.xlu0 %742 }
 0x2c8   :  { %v3140_v61 = vpop.permute.xlu1 %752 }
 0x2ca   :  { %v3142_v62 = vpop.permute.xlu0 %1015 }
 0x2cc   :  { %v3144_v63 = vpop.permute.xlu1 %758 }
 0x2ce   :  { %v3146_v0 = vpop.permute.xlu0 %1021 }
 0x2d0   :  { %v3148_v1 = vpop.permute.xlu1 %1031 }
 0x2d2   :  { %v3150_v2 = vpop.permute.xlu0 %754 }
 0x2d4   :  { %v968_v4 = vpop.permute.xlu1 %967 }
 0x2d6   :  { %v3152_v5 = vpop.permute.xlu0 %760 }
 0x2d8   :  { %v715_v8 = vpop.permute.xlu1 %714 }
 0x2d9   :  { %v789_v28 = vsel %vm788_vm9, %v786_v55, %v715_v8 }
 0x2da   :  { %v3156_v11 = vpop.permute.xlu0 %1033  ;;  %v791_v38 = vsel %vm82_vm0, %v789_v28, %v3100_v13  ;;  %v1059_v13 = vsel %vm3639_vm13, %v1057_v53, %v968_v4 }
 0x2db   :  { %v794_v20 = vsel %vm3647_vm8, %v791_v38, %v3114_v26  ;;  %v1061_v12 = vsel %vm779_vm14, %v1059_v13, %v976_v52 }
 0x2dc   :  { %v984_v34 = vpop.permute.xlu1 %983 }
 0x2dd   :  { %v1063_v45 = vsel %vm782_vm15, %v1061_v12, %v984_v34 }
 0x2de   :  { %v970_v47 = vpop.permute.xlu0 %969 }
 0x2e0   :  { %v992_v6 = vpop.permute.xlu1 %991 }
 0x2e2   :  { %v717_v37 = vpop.permute.xlu0 %716 }
 0x2e3   :  { %v790_v40 = vsel %vm788_vm9, %v787_v16, %v717_v37 }
 0x2e4   :  { %v1026_v46 = vpop.permute.xlu1 %1025  ;;  %v792_v19 = vsel %vm82_vm0, %v790_v40, %v3112_v22  ;;  %v797_v22 = vsel %vm3638_vm2, %v794_v20, %v3116_v31 }
 0x2e5   :  { %v795_v50 = vsel %vm3647_vm8, %v792_v19, %v3120_v35  ;;  %v800_v3 = vsel %vm3646_vm3, %v797_v22, %v741_v54  ;;  %v1056_v35 = vsel %vm3641_vm11, %v2974_v10, %v3130_v49  ;;  %vm3642_vm11 = vcmask 982016  }
 0x2e6   :  { %v986_v23 = vpop.permute.xlu0 %985  ;;  %v798_v8 = vsel %vm3638_vm2, %v795_v50, %v3124_v39  ;;  %v1058_v31 = vsel %vm3640_vm12, %v1056_v35, %v3132_v51  ;;  %v1065_v39 = vsel %vm785_vm10, %v1063_v45, %v992_v6  ;;  %v803_v54 = vsel %vm3645_vm1, %v800_v3, %v3122_v36 }
 0x2e7   :  { %v801_v4 = vsel %vm3646_vm3, %v798_v8, %v743_v60  ;;  %v1060_v52 = vsel %vm3639_vm13, %v1058_v31, %v970_v47  ;;  %vm3644_vm2 = vcmask 850944   ;;  %vm3643_vm13 = vcmask 916480  }
 0x2e8   :  { %v765_v32 = vpop.permute.xlu1 %764  ;;  %v804_v34 = vsel %vm3645_vm1, %v801_v4, %v3128_v44  ;;  %v1062_v60 = vsel %vm779_vm14, %v1060_v52, %v3136_v58  ;;  %v806_v47 = vsel %vm3644_vm2, %v803_v54, %v3140_v61  ;;  %vm3660_vm12 = vcmask 654336   ;;  %v2638_v52 = vld [vmem:[%s3617_s2 + $0x58] sm:$0xff]   ;;  %v2640_v54 = vld [vmem:[%s3617_s2 + $0x68] sm:$0xff]  }
 0x2e9   :  { %v807_v44 = vsel %vm3644_vm2, %v804_v34, %v3150_v2  ;;  %v809_v58 = vsel %vm3643_vm13, %v806_v47, %v3144_v63  ;;  %v1525_v34 = vld [vmem:[%s3619_s4] sm:$0xff]  ;;  %v1528_v47 = vld [vmem:[%s3619_s4 + $0x18] sm:$0xff] }
 0x2ea   :  { %v994_v56 = vpop.permute.xlu0 %993  ;;  %v812_v16 = vsel %vm3642_vm11, %v809_v58, %v765_v32  ;;  %v1532_v58 = vld [vmem:[%s3619_s4 + $0x38] sm:$0xff] }
 0x2eb   :  { %v1088_v19 = vrot.slane %v812_v16, %v2910_v30  ;;  %v1534_v16 = vld [vmem:[%s3619_s4 + $0x48] sm:$0xff] }
 0x2ec   :  { %v1038_v26 = vpop.permute.xlu1 %1037 }
 0x2ed   :  { %v1093_v50 = vmul.f32 %v1088_v19, %v2880_v24  ;;  %v1094_v53 = vmul.f32 %v1088_v19, %v2888_v29  ;;  %v1540_v19 = vld [vmem:[%s3619_s4 + $0x78] sm:$0xff] }
 0x2ee   :  { %v1028_v43 = vpop.permute.xlu0 %1027 }
 0x2f0   :  { %v1000_v15 = vpop.permute.xlu1 %999 }
 0x2f1   :  { %v1067_v18 = vsel %vm788_vm9, %v1065_v39, %v1000_v15  ;;  %v3661_v15 = vmov 0.0  }
 0x2f2   :  { %v1069_v10 = vsel %vm82_vm0, %v1067_v18, %v3118_v33  ;;  %v767_v49 = vpop.permute.xlu0 %766  ;;  %v1064_v33 = vsel %vm782_vm15, %v1062_v60, %v986_v23  ;;  %v2641_v18 = vld [vmem:[%s3617_s2 + $0x70] sm:$0xff]  }
 0x2f3   :  { %v1071_v51 = vsel %vm3647_vm8, %v1069_v10, %v3134_v57  ;;  %v1066_v55 = vsel %vm785_vm10, %v1064_v33, %v994_v56  ;;  %v2642_v10 = vld [vmem:[%s3617_s2 + $0x78] sm:$0xff]   ;;  %v1529_v33 = vld [vmem:[%s3619_s4 + $0x20] sm:$0xff] }
 0x2f4   :  { %v1073_v36 = vsel %vm3660_vm12, %v1071_v51, %v3138_v59  ;;  %v1040_v6 = vpop.permute.xlu1 %1039  ;;  %v810_v59 = vsel %vm3643_vm13, %v807_v44, %v3152_v5  ;;  %v1527_v51 = vld [vmem:[%s3619_s4 + $0x10] sm:$0xff]  ;;  %v1530_v44 = vld [vmem:[%s3619_s4 + $0x28] sm:$0xff] }
 0x2f5   :  { %v1075_v61 = vsel %vm3646_vm3, %v1073_v36, %v1026_v46  ;;  %v813_v2 = vsel %vm3642_vm11, %v810_v59, %v767_v49  ;;  %v1526_v49 = vld [vmem:[%s3619_s4 + $0x8] sm:$0xff]  ;;  %v2560_v36 = vpack.c.bf16 %v1528_v47, %v1527_v51 }
 0x2f6   :  { %v1002_v57 = vpop.permute.xlu0 %1001  ;;  %v1077_v46 = vsel %vm3645_vm1, %v1075_v61, %v3148_v1  ;;  %v1092_v23 = vrot.slane %v813_v2, %v2910_v30  ;;  %v2557_v60 = vpack.c.bf16 %v1526_v49, %v1525_v34  ;;  %v1533_v61 = vld [vmem:[%s3619_s4 + $0x40] sm:$0xff] }
 0x2f7   :  { %v1068_v25 = vsel %vm788_vm9, %v1066_v55, %v1002_v57  ;;  %v2563_v55 = vpack.c.bf16 %v1530_v44, %v1529_v33  ;;  %v1531_v57 = vld [vmem:[%s3619_s4 + $0x30] sm:$0xff]  ;;  %v2569_v59 = vpack.c.bf16 %v1534_v16, %v1533_v61 }
 0x2f8   :  { %v1070_v28 = vsel %vm82_vm0, %v1068_v25, %v3126_v41  ;;  %v1046_v37 = vpop.permute.xlu1 %1045  ;;  %v1096_v22 = vmul.f32 %v1092_v23, %v2884_v27  ;;  %v2637_v27 = vld [vmem:[%s3617_s2 + $0x50] sm:$0xff]   ;;  %v2566_v25 = vpack.c.bf16 %v1532_v58, %v1531_v57 }
 0x2f9   :  { %v1072_v40 = vsel %vm3647_vm8, %v1070_v28, %v3142_v62  ;;  %v1079_v62 = vsel %vm3644_vm2, %v1077_v46, %v1038_v26  ;;  %v1535_v28 = vld [vmem:[%s3619_s4 + $0x50] sm:$0xff] }
 0x2fa   :  { %v1074_v63 = vsel %vm3660_vm12, %v1072_v40, %v3146_v0  ;;  %v1044_v38 = vpop.permute.xlu0 %1043  ;;  %vm3662_vm12 = vmmov 0   ;;  %v1537_v40 = vld [vmem:[%s3619_s4 + $0x60] sm:$0xff] }
 0x2fb   :  { %v1076_v5 = vsel %vm3646_vm3, %v1074_v63, %v1028_v43  ;;  %v1081_v0 = vsel %vm3643_vm13, %v1079_v62, %v1044_v38  ;;  %v1538_v63 = vld [vmem:[%s3619_s4 + $0x68] sm:$0xff]  ;;  %v1539_v38 = vld [vmem:[%s3619_s4 + $0x70] sm:$0xff] }
 0x2fc   :  { %v1078_v41 = vsel %vm3645_vm1, %v1076_v5, %v3156_v11  ;;  %v1052_v48 = vpop.permute.xlu1 %1051  ;;  %v1095_v11 = vmul.f32 %v1092_v23, %v2878_v21  ;;  %v2636_v21 = vld [vmem:[%s3617_s2 + $0x48] sm:$0xff]   ;;  %v2575_v46 = vpack.c.bf16 %v1538_v63, %v1537_v40  ;;  %v2578_v5 = vpack.c.bf16 %v1540_v19, %v1539_v38 }
 0x2fd   :  { %v1080_v20 = vsel %vm3644_vm2, %v1078_v41, %v1040_v6  ;;  %v3663_v6 = vmov 0.0|0.0  }
 0x2fe   :  { %v1082_v32 = vsel %vm3643_vm13, %v1080_v20, %v1046_v37  ;;  %v1050_v1 = vpop.permute.xlu0 %1049  ;;  %v1536_v37 = vld [vmem:[%s3619_s4 + $0x58] sm:$0xff]  ;;  %s2718_s4 = smov [#allocation5]  }
 0x2ff   :  { %v1084_v56 = vsel %vm3642_vm11, %v1082_v32, %v1052_v48  ;;  %v1083_v13 = vsel %vm3642_vm11, %v1081_v0, %v1050_v1  ;;  %v2572_v2 = vpack.c.bf16 %v1536_v37, %v1535_v28  ;;  %vm3665_vm11 = vcmp.lt.s32.totalorder %v2834_v42, 1 }
 0x300   :  { %v1104_v8 = vrot.slane %v1084_v56, %v2910_v30  ;;  %v1100_v26 = vrot.slane %v1083_v13, %v2910_v30  ;;  %vm3666_vm13 = vmmov %vm3665_vm11 }
 0x301   :  { %vm3668_vm1 = vmmov %vm3665_vm11 }
 0x302   :  { %v1107_v12 = vadd.f32 %v1104_v8, %v1095_v11  ;;  %v1108_v3 = vadd.f32 %v1104_v8, %v1096_v22  ;;  %v1105_v43 = vadd.f32 %v1100_v26, %v1093_v50  ;;  %v1106_v35 = vadd.f32 %v1100_v26, %v1094_v53  ;;  %vm3670_vm8 = vmmov %vm3668_vm1 }
 0x304   :  { %v1111_v45 = vmax.f32 %v1107_v12, 0.0  ;;  %v1112_v24 = vmax.f32 %v1108_v3, 0.0  ;;  %v1109_v4 = vmax.f32 %v1105_v43, 0.0  ;;  %v1110_v29 = vmax.f32 %v1106_v35, 0.0 }
 0x306   :  { %v1114_v31 = vpack.c.bf16 %v1112_v24, %v1111_v45  ;;  %v1113_v39 = vpack.c.bf16 %v1110_v29, %v1109_v4 }
 0x308   :  { %2453 = vmatprep.mubr.bf16.mxu0 %v1113_v39  ;;  %2473 = vmatprep.mubr.bf16.mxu1 %v1113_v39 }
 0x309   :  { %2454 = vmatmul.mubr.bf16.vlgmr.msra.gmra.mrb[8].mxu0 %v1114_v31  ;;  %2474 = vmatmul.mubr.bf16.vlgmr.msra.gmra.mrb[8].mxu1 %v1114_v31 }
 0x30a   :  { %2478 = vmatpush3.bf16.msra.mxu0 %v3106_v14  ;;  %2493 = vmatprep.mubr.bf16.mxu0 %v1113_v39  ;;  %v2639_v14 = vld [vmem:[%s3617_s2 + $0x60] sm:$0xff]  }
 0x30b   :  { %2479 = vmatprep.subr.bf16.mxu0 %v2636_v21  ;;  %2529 = vmatprep.mubr.msk.f32.mxu1 %vm3662_vm12, %v3661_v15  ;;  %vm3664_vm12 = vcmp.lt.s32.totalorder %v2834_v42, 7 }
 0x30c   :  { %2558 = vmatpush3.bf16.msra.mxu1 %v2557_v60  ;;  %vm3667_vm2 = vmmov %vm3664_vm12  ;;  %v3678_v60 = vld [vmem:[#allocation11_spill] sm:$0xff] }
 0x30d   :  { %2559 = vmatprep.subr.bf16.mxu1 %v3663_v6  ;;  %vm3669_vm3 = vmmov %vm3667_vm2 }
 0x30e   :  { %2480 = vmatpush3.bf16.msra.mxu0 %v2636_v21 }
 0x30f   :  { %2481 = vmatprep.subr.bf16.mxu0 %v2637_v27 }
 0x310   :  { %2561 = vmatpush3.bf16.msra.mxu1 %v2560_v36 }
 0x311   :  { %2562 = vmatprep.subr.bf16.mxu1 %v3663_v6 }
 0x312   :  { %2482 = vmatpush3.bf16.msra.mxu0 %v2637_v27 }
 0x313   :  { %2483 = vmatprep.subr.bf16.mxu0 %v2638_v52 }
 0x314   :  { %2564 = vmatpush3.bf16.msra.mxu1 %v2563_v55 }
 0x315   :  { %2565 = vmatprep.subr.bf16.mxu1 %v3663_v6 }
 0x316   :  { %2484 = vmatpush3.bf16.msra.mxu0 %v2638_v52 }
 0x317   :  { %2485 = vmatprep.subr.bf16.mxu0 %v2639_v14 }
 0x318   :  { %2567 = vmatpush3.bf16.msra.mxu1 %v2566_v25 }
 0x319   :  { %2568 = vmatprep.subr.bf16.mxu1 %v3663_v6 }
 0x31a   :  { %2486 = vmatpush3.bf16.msra.mxu0 %v2639_v14 }
 0x31b   :  { %2487 = vmatprep.subr.bf16.mxu0 %v2640_v54 }
 0x31c   :  { %2570 = vmatpush3.bf16.msra.mxu1 %v2569_v59 }
 0x31d   :  { %2571 = vmatprep.subr.bf16.mxu1 %v3663_v6 }
 0x31e   :  { %2488 = vmatpush3.bf16.msra.mxu0 %v2640_v54 }
 0x31f   :  { %2489 = vmatprep.subr.bf16.mxu0 %v2641_v18 }
 0x320   :  { %2573 = vmatpush3.bf16.msra.mxu1 %v2572_v2 }
 0x321   :  { %2574 = vmatprep.subr.bf16.mxu1 %v3663_v6 }
 0x322   :  { %2490 = vmatpush3.bf16.msra.mxu0 %v2641_v18 }
 0x323   :  { %2491 = vmatprep.subr.bf16.mxu0 %v2642_v10 }
 0x324   :  { %2576 = vmatpush3.bf16.msra.mxu1 %v2575_v46 }
 0x325   :  { %2577 = vmatprep.subr.bf16.mxu1 %v3663_v6 }
 0x326   :  { %2492 = vmatpush3.bf16.msra.mxu0 %v2642_v10 }
 0x328   :  { %2579 = vmatpush3.bf16.msra.mxu1 %v2578_v5 }
 0x329   :  { %2494 = vmatmul.mubr.bf16.vlgmr.msra.gmra.mrb[12].mxu0 %v1114_v31 }
 0x3dc   :  { %v2455_v23 = vpop.f32.mrb[8].mxu0  ;;  %v2475_v41 = vpop.f32.mrb[8].mxu1 }
 0x3dd   :  { %v1213_v20 = vpop.f32.mrb[9].mxu0  ;;  %v1344_v62 = vpop.f32.mrb[9].mxu1  ;;  %v1361_v50 = vrot.slane %v2455_v23, 7  ;;  %v1373_v53 = vrot.slane %v2475_v41, 1 }
 0x3de   :  { %v1359_v32 = vrot.slane %v1213_v20, 7  ;;  %v1371_v0 = vrot.slane %v1344_v62, 1  ;;  %v2456_v48 = vpop.f32.mrb[10].mxu0  ;;  %v2476_v1 = vpop.f32.mrb[10].mxu1 }
 0x3df   :  { %v1362_v56 = vrot.slane %v2456_v48, 7  ;;  %v1374_v13 = vrot.slane %v2476_v1, 1  ;;  %v1216_v11 = vpop.f32.mrb[11].mxu0  ;;  %v1347_v22 = vpop.f32.mrb[11].mxu1 }
 0x3e0   :  { %v1360_v8 = vrot.slane %v1216_v11, 7  ;;  %v1372_v26 = vrot.slane %v1347_v22, 1 }
 0x3e1   :  { %v1375_v12 = vsel %vm3664_vm12, %v1373_v53, %v1374_v13  ;;  %v1366_v3 = vsel %vm3665_vm11, %v1362_v56, %v1359_v32  ;;  %v1363_v43 = vsel %vm3666_vm13, %v1361_v50, %v1362_v56  ;;  %v1378_v35 = vsel %vm3667_vm2, %v1374_v13, %v1371_v0  ;;  %vm3671_vm12 = vmmov %vm3667_vm2 }
 0x3e2   :  { %v1364_v45 = vsel %vm3668_vm1, %v1360_v8, %v1361_v50  ;;  %v1377_v24 = vsel %vm3669_vm3, %v1371_v0, %v1372_v26  ;;  %v1365_v4 = vsel %vm3670_vm8, %v1359_v32, %v1360_v8  ;;  %v1376_v29 = vsel %vm3671_vm12, %v1372_v26, %v1373_v53 }
 0x3e3   :  { %v1369_v31 = vsel %vm2858_vm4, %v1364_v45, 0.0  ;;  %v1367_v27 = vsel %vm2862_vm5, %v1366_v3, 0.0  ;;  %v1382_v42 = vsel %vm2870_vm6, %v1378_v35, 0.0  ;;  %v1380_v47 = vsel %vm2874_vm7, %v1376_v29, 0.0 }
 0x3e4   :  { %vm3673_vm1 = vcmask 1041409   ;;  %vm3674_vm2 = vcmask 1043459   ;;  %vm3675_vm3 = vcmask 1041408   ;;  %vm3679_vm4 = vcmask 64512  }
 0x3e5   :  { %vm3680_vm5 = vcmask 130048   ;;  %vm3681_vm6 = vmmov %vm3679_vm4  ;;  %vm3683_vm8 = vcmask 195584   ;;  %vm3685_vm13 = vcmask 588800   ;;  %vm3686_vm12 = vcmask 654336  }
 0x3e6   :  { %vm3682_vm7 = vmmov %vm3680_vm5 }
 0x3e7   :  { %vm3684_vm11 = vmmov %vm3683_vm8 }
 0x3fc   :  { %v2495_v39 = vpop.f32.mrb[12].mxu0 }
 0x3fd   :  { %v1474_v21 = vadd.f32 %v2495_v39, %v1369_v31  ;;  %v1465_v52 = vpop.f32.mrb[13].mxu0 }
 0x3fe   :  { %v1466_v14 = vadd.f32 %v1465_v52, %v1367_v27  ;;  %v2496_v54 = vpop.f32.mrb[14].mxu0 }
 0x3ff   :  { %v3350_v18 = vadd.f32 %v1474_v21, %v1375_v12  ;;  %v1477_v10 = vadd.f32 %v2496_v54, %v1363_v43  ;;  %v1468_v34 = vpop.f32.mrb[15].mxu0 }
 0x400   :  { %v3352_v49 = vadd.f32 %v1466_v14, %v1377_v24  ;;  %v1469_v51 = vadd.f32 %v1468_v34, %v1365_v4  ;;  %v3676_v4 = vld [vmem:[#allocation9_spill] sm:$0xff] }
 0x401   :  { %v3356_v7 = vadd.f32 %v1477_v10, %v1382_v42  ;;  %v1500_v36 = vmul.f32 %v3350_v18, %v3350_v18  ;;  %v3677_v10 = vld [vmem:[#allocation10_spill] sm:$0xff] }
 0x402   :  { %v3360_v9 = vadd.f32 %v1469_v51, %v1380_v47  ;;  %v1498_v17 = vmul.f32 %v3352_v49, %v3352_v49 }
 0x403   :  { %v1491_v6 = vadd.f32 %v3356_v7, %v3350_v18  ;;  %v1501_v33 = vmul.f32 %v3356_v7, %v3356_v7 }
 0x404   :  { %v1484_v44 = vadd.f32 %v3360_v9, %v3352_v49  ;;  %v1499_v55 = vmul.f32 %v3360_v9, %v3360_v9 }
 0x405   :  { %v1492_v57 = vrot.slane %v1491_v6, 4  ;;  %v1509_v58 = vadd.f32 %v1501_v33, %v1500_v36 }
 0x406   :  { %v1485_v25 = vrot.slane %v1484_v44, 4  ;;  %v1502_v61 = vadd.f32 %v1499_v55, %v1498_v17 }
 0x407   :  { %v1493_v16 = vadd.f32 %v1492_v57, %v1491_v6  ;;  %v1510_v59 = vrot.slane %v1509_v58, 4 }
 0x408   :  { %v1486_v28 = vadd.f32 %v1485_v25, %v1484_v44  ;;  %v1503_v37 = vrot.slane %v1502_v61, 4 }
 0x409   :  { %v1494_v2 = vrot.slane %v1493_v16, 2  ;;  %v1511_v40 = vadd.f32 %v1510_v59, %v1509_v58 }
 0x40a   :  { %v1487_v63 = vrot.slane %v1486_v28, 2  ;;  %v1504_v46 = vadd.f32 %v1503_v37, %v1502_v61 }
 0x40b   :  { %v1495_v38 = vadd.f32 %v1494_v2, %v1493_v16  ;;  %v1512_v19 = vrot.slane %v1511_v40, 2 }
 0x40c   :  { %v1488_v5 = vadd.f32 %v1487_v63, %v1486_v28  ;;  %v1505_v23 = vrot.slane %v1504_v46, 2 }
 0x40d   :  { %v1496_v41 = vrot.slane %v1495_v38, 1  ;;  %v1513_v20 = vadd.f32 %v1512_v19, %v1511_v40 }
 0x40e   :  { %v1489_v62 = vrot.slane %v1488_v5, 1  ;;  %v1506_v32 = vadd.f32 %v1505_v23, %v1504_v46 }
 0x40f   :  { %v1514_v0 = vrot.slane %v1513_v20, 1  ;;  %v1497_v1 = vadd.f32 %v1496_v41, %v1495_v38 }
 0x410   :  { %v1490_v48 = vadd.f32 %v1489_v62, %v1488_v5  ;;  %v1507_v50 = vrot.slane %v1506_v32, 1 }
 0x411   :  { %v1515_v53 = vadd.f32 %v1514_v0, %v1513_v20 }
 0x412   :  { %v1508_v56 = vadd.f32 %v1507_v50, %v1506_v32  ;;  %v1518_v13 = vsel %vm3673_vm1, %v1497_v1, %v1490_v48  ;;  %vm3687_vm1 = vmmov %vm3685_vm13 }
 0x414   :  { %v1522_v11 = vsel %vm3674_vm2, %v1515_v53, %v1508_v56  ;;  %vm3688_vm2 = vcmask 719872  }
 0x415   :  { %v1524_v22 = vsel %vm3675_vm3, %v1518_v13, %v1522_v11  ;;  %vm3689_vm3 = vmmov %vm3686_vm12 }
 0x416   :  { %2530 = vmatmul.mubr.f32.vlgmr.msra.gmra.mrb[6].mxu1 %v1524_v22 }
 0x4e9   :  { %v1607_v8 = vpop.f32.mrb[6].mxu1 }
 0x4ea   :  { %v1611_v26 = vmul.f32 0.00390625, %v1607_v8  ;;  %v2531_v12 = vpop.f32.mrb[7].mxu1 }
 0x4ec   :  { %v1612_v3 = vmul.f32 %v1611_v26, %v1611_v26  ;;  %v1888_v51 = vsub.f32 0.0, %v1611_v26 }
 0x4ee   :  { %v1614_v43 = vrot.slane %v1612_v3, 6 }
 0x4f0   :  { %v1616_v35 = vsub.f32 %v1611_v26, %v1614_v43 }
 0x4f2   :  { %v1617_v45 = vadd.f32 1e-05, %v1616_v35 }
 0x4f4   :  { %2645 = vrsqrt.f32 %v1617_v45 }
 0x4fe   :  { %v2646_v24 = vpop.eup %2645 }
 0x4ff   :  { %v1626_v29 = vrot.slane %v2646_v24, %v3676_v4  ;;  %v1889_v54 = vrot.slane %v2646_v24, 2 }
 0x501   :  { %v1634_v31 = vrot.slane %v1626_v29, %v3676_v4  ;;  %v1627_v39 = vcombine.high %v1626_v29, %v1626_v29  ;;  %v1891_v6 = vmul.f32 %v1889_v54, %v1888_v51 }
 0x503   :  { %v1642_v21 = vcombine.high %v1634_v31, %v1634_v31  ;;  %v1641_v27 = vrot.slane %v1627_v39, %v3676_v4  ;;  %v1899_v57 = vrot.slane %v1891_v6, %v3676_v4 }
 0x505   :  { %v1647_v52 = vrot.slane %v1642_v21, %v2910_v30  ;;  %v1643_v14 = vcombine.high %v1641_v27, %v1641_v27  ;;  %v1900_v28 = vcombine.high %v1899_v57, %v1899_v57  ;;  %v1907_v63 = vrot.slane %v1899_v57, %v3676_v4 }
 0x507   :  { %v1661_v34 = vrot.slane %v1647_v52, %v3677_v10  ;;  %v1651_v42 = vrot.slane %v1643_v14, %v2910_v30  ;;  %v1654_v55 = vcombine.high %v1647_v52, %v3661_v15  ;;  %v1914_v38 = vrot.slane %v1900_v28, %v3676_v4 }
 0x508   :  { %v1918_v19 = vrot.slane %v1907_v63, %v2910_v30 }
 0x509   :  { %v3384_v47 = vrot.slane %v1661_v34, %v3678_v60  ;;  %v1710_v36 = vrot.slane %v1651_v42, %v3677_v10  ;;  %v1669_v44 = vcombine.high %v1661_v34, %v3661_v15  ;;  %v1703_v61 = vcombine.high %v1651_v42, %v3661_v15 }
 0x50a   :  { %v1668_v59 = vrot.slane %v1654_v55, %v3677_v10  ;;  %v1922_v5 = vrot.slane %v1914_v38, %v2910_v30  ;;  %v1932_v23 = vrot.slane %v1918_v19, %v3677_v10  ;;  %v1925_v8 = vcombine.high %v1918_v19, %v3661_v15 }
 0x50b   :  { %1810 = vrot.lane.b32.xlu0 %v3384_v47, %s2696_s28  ;;  %v3390_v33 = vrot.slane %v1710_v36, %v3678_v60  ;;  %v1699_v17 = vcombine.high %v3384_v47, %v3661_v15  ;;  %v1718_v25 = vcombine.high %v1710_v36, %v3661_v15  ;;  %v1683_v16 = vrot.slane %v1669_v44, %v3678_v60 }
 0x50c   :  { %v1717_v2 = vrot.slane %v1703_v61, %v3677_v10  ;;  %v1691_v40 = vrot.slane %v1668_v59, %v3678_v60  ;;  %v1981_v41 = vrot.slane %v1922_v5, %v3677_v10  ;;  %v3426_v20 = vrot.slane %v1932_v23, %v3678_v60 }
 0x50d   :  { %1812 = vrot.lane.b32.xlu1 %v3390_v33, %s2696_s28  ;;  %v1748_v58 = vcombine.high %v3390_v33, %v3661_v15  ;;  %v1732_v37 = vrot.slane %v1718_v25, %v3678_v60  ;;  %v1700_v32 = vcombine.high %v1683_v16, %v3661_v15  ;;  %v1684_v1 = vcombine.high %v1668_v59, %v3661_v15 }
 0x50e   :  { %v1740_v46 = vrot.slane %v1717_v2, %v3678_v60  ;;  %v3431_v62 = vrot.slane %v1981_v41, %v3678_v60  ;;  %v1701_v48 = vcombine.high %v1691_v40, %v3661_v15  ;;  %v1733_v53 = vcombine.high %v1717_v2, %v3661_v15 }
 0x50f   :  { %1754 = vrot.lane.b32.xlu0 %v1699_v17, %s2704_s3  ;;  %v1749_v0 = vcombine.high %v1732_v37, %v3661_v15  ;;  %v1698_v56 = vrot.slane %v1684_v1, %v3678_v60  ;;  %v1970_v11 = vcombine.high %v3426_v20, %v3661_v15  ;;  %v1940_v22 = vcombine.high %v1932_v23, %v3661_v15 }
 0x510   :  { %v1750_v50 = vcombine.high %v1740_v46, %v3661_v15  ;;  %v1747_v13 = vrot.slane %v1733_v53, %v3678_v60  ;;  %v2019_v26 = vcombine.high %v3431_v62, %v3661_v15  ;;  %v1989_v12 = vcombine.high %v1981_v41, %v3661_v15 }
 0x511   :  { %1756 = vrot.lane.b32.xlu1 %v1748_v58, %s2704_s3  ;;  %v1974_v3 = vcombine.high %v1922_v5, %v3661_v15  ;;  %v1954_v43 = vrot.slane %v1940_v22, %v3678_v60  ;;  %v1939_v35 = vrot.slane %v1925_v8, %v3677_v10  ;;  %v1702_v31 = vcombine.high %v1698_v56, %v3661_v15 }
 0x512   :  { %v2003_v45 = vrot.slane %v1989_v12, %v3678_v60  ;;  %v1751_v39 = vcombine.high %v1747_v13, %v3661_v15 }
 0x513   :  { %1762 = vrot.lane.b32.xlu0 %v1683_v16, %s2705_s15  ;;  %v1988_v24 = vrot.slane %v1974_v3, %v3677_v10  ;;  %v1962_v4 = vrot.slane %v1939_v35, %v3678_v60  ;;  %v1971_v21 = vcombine.high %v1954_v43, %v3661_v15  ;;  %v1955_v52 = vcombine.high %v1939_v35, %v3661_v15 }
 0x514   :  { %v2020_v27 = vcombine.high %v2003_v45, %v3661_v15 }
 0x515   :  { %1764 = vrot.lane.b32.xlu1 %v1732_v37, %s2705_s15  ;;  %v2011_v29 = vrot.slane %v1988_v24, %v3678_v60  ;;  %v1972_v14 = vcombine.high %v1962_v4, %v3661_v15  ;;  %v2004_v54 = vcombine.high %v1988_v24, %v3661_v15  ;;  %v1969_v34 = vrot.slane %v1955_v52, %v3678_v60 }
 0x517   :  { %1778 = vrot.lane.b32.xlu0 %v1691_v40, %s2706_s16  ;;  %v2021_v10 = vcombine.high %v2011_v29, %v3661_v15  ;;  %v2018_v42 = vrot.slane %v2004_v54, %v3678_v60  ;;  %v1973_v51 = vcombine.high %v1969_v34, %v3661_v15 }
 0x519   :  { %1780 = vrot.lane.b32.xlu1 %v1740_v46, %s2706_s16  ;;  %v2022_v60 = vcombine.high %v2018_v42, %v3661_v15 }
 0x51b   :  { %1816 = vrot.lane.b32.xlu0 %v1699_v17, %s2707_s17 }
 0x51d   :  { %1818 = vrot.lane.b32.xlu1 %v1748_v58, %s2707_s17 }
 0x51f   :  { %1822 = vrot.lane.b32.xlu0 %v1683_v16, %s2709_s19 }
 0x521   :  { %1824 = vrot.lane.b32.xlu1 %v1732_v37, %s2709_s19 }
 0x523   :  { %2081 = vrot.lane.b32.xlu0 %v3426_v20, %s2696_s28 }
 0x525   :  { %2083 = vrot.lane.b32.xlu1 %v3431_v62, %s2696_s28  ;;  %s2196_s28 = sshll.u32 %s2718_s4, 4  ;;  %s2197_s28 = int_to_ptr.vmem [resolvable:$true] %s2196_s28 }
 0x526   :  { %p2674_p9 = scmp.lt.s32.totalorder %s2197_s28, %s2197_s28 }
 0x527   :  { %1834 = vrot.lane.b32.xlu0 %v1691_v40, %s2710_s20 }
 0x529   :  { %1836 = vrot.lane.b32.xlu1 %v1740_v46, %s2710_s20 }
 0x52b   :  { %1770 = vrot.lane.b32.xlu0 %v1700_v32, %s2708_s18 }
 0x52d   :  { %1772 = vrot.lane.b32.xlu1 %v1749_v0, %s2708_s18 }
 0x52f   :  { %1786 = vrot.lane.b32.xlu0 %v1701_v48, %s2711_s21 }
 0x531   :  { %1788 = vrot.lane.b32.xlu1 %v1750_v50, %s2711_s21 }
 0x533   :  { %1794 = vrot.lane.b32.xlu0 %v1698_v56, %s2712_s22 }
 0x535   :  { %1796 = vrot.lane.b32.xlu1 %v1747_v13, %s2712_s22 }
 0x537   :  { %2025 = vrot.lane.b32.xlu0 %v1970_v11, %s2704_s3 }
 0x539   :  { %2027 = vrot.lane.b32.xlu1 %v2019_v26, %s2704_s3 }
 0x53b   :  { %2033 = vrot.lane.b32.xlu0 %v1954_v43, %s2705_s15 }
 0x53d   :  { %2035 = vrot.lane.b32.xlu1 %v2003_v45, %s2705_s15  ;;  %s2669_s15 = scalar_lea.vmem %s2197_s28, 512 }
 0x53e   :  { %p2670_p8 = scmp.ne.s32.totalorder %s2197_s28, %s2669_s15  ;;  %p2675_p10 = scmp.lt.s32.totalorder %s2669_s15, %s2669_s15 }
 0x53f   :  { %2049 = vrot.lane.b32.xlu0 %v1962_v4, %s2706_s16 }
 0x540   :  { %p2676_p11 = por %p2675_p10, %p2674_p9 }
 0x541   :  { %2051 = vrot.lane.b32.xlu1 %v2011_v29, %s2706_s16 }
 0x542   :  { %p2677_p12 = pnand %p2676_p11, %p2670_p8 }
 0x543   :  { %1828 = vrot.lane.b32.xlu0 %v1700_v32, %s2713_s23 }
 0x545   :  { %1830 = vrot.lane.b32.xlu1 %v1749_v0, %s2713_s23 }
 0x547   :  { %2087 = vrot.lane.b32.xlu0 %v1970_v11, %s2707_s17 }
 0x549   :  { %2089 = vrot.lane.b32.xlu1 %v2019_v26, %s2707_s17 }
 0x54b   :  { %2093 = vrot.lane.b32.xlu0 %v1954_v43, %s2709_s19 }
 0x54d   :  { %2095 = vrot.lane.b32.xlu1 %v2003_v45, %s2709_s19 }
 0x54f   :  { %1840 = vrot.lane.b32.xlu0 %v1701_v48, %s2714_s24 }
 0x551   :  { %1842 = vrot.lane.b32.xlu1 %v1750_v50, %s2714_s24 }
 0x553   :  { %1846 = vrot.lane.b32.xlu0 %v1698_v56, %s2715_s25 }
 0x555   :  { %1848 = vrot.lane.b32.xlu1 %v1747_v13, %s2715_s25 }
 0x557   :  { %2105 = vrot.lane.b32.xlu0 %v1962_v4, %s2710_s20 }
 0x559   :  { %2107 = vrot.lane.b32.xlu1 %v2011_v29, %s2710_s20 }
 0x55b   :  { %1802 = vrot.lane.b32.xlu0 %v1702_v31, %s2716_s26 }
 0x55d   :  { %1804 = vrot.lane.b32.xlu1 %v1751_v39, %s2716_s26 }
 0x55f   :  { %2041 = vrot.lane.b32.xlu0 %v1971_v21, %s2708_s18 }
 0x561   :  { %2043 = vrot.lane.b32.xlu1 %v2020_v27, %s2708_s18 }
 0x563   :  { %2057 = vrot.lane.b32.xlu0 %v1972_v14, %s2711_s21 }
 0x565   :  { %2059 = vrot.lane.b32.xlu1 %v2021_v10, %s2711_s21 }
 0x567   :  { %2065 = vrot.lane.b32.xlu0 %v1969_v34, %s2712_s22 }
 0x569   :  { %2067 = vrot.lane.b32.xlu1 %v2018_v42, %s2712_s22 }
 0x56b   :  { %2099 = vrot.lane.b32.xlu0 %v1971_v21, %s2713_s23 }
 0x56d   :  { %2101 = vrot.lane.b32.xlu1 %v2020_v27, %s2713_s23 }
 0x56f   :  { %1852 = vrot.lane.b32.xlu0 %v1702_v31, %s2717_s13 }
 0x571   :  { %1854 = vrot.lane.b32.xlu1 %v1751_v39, %s2717_s13 }
 0x573   :  { %2111 = vrot.lane.b32.xlu0 %v1972_v14, %s2714_s24 }
 0x575   :  { %2113 = vrot.lane.b32.xlu1 %v2021_v10, %s2714_s24 }
 0x577   :  { %2073 = vrot.lane.b32.xlu0 %v1973_v51, %s2716_s26 }
 0x579   :  { %2075 = vrot.lane.b32.xlu1 %v2022_v60, %s2716_s26 }
 0x57b   :  { %2117 = vrot.lane.b32.xlu0 %v1969_v34, %s2715_s25 }
 0x57d   :  { %v1811_v36 = vpop.permute.xlu0 %1810  ;;  %2119 = vrot.lane.b32.xlu1 %v2018_v42, %s2715_s25 }
 0x57f   :  { %2123 = vrot.lane.b32.xlu0 %v1973_v51, %s2717_s13  ;;  %v1813_v6 = vpop.permute.xlu1 %1812 }
 0x581   :  { %v1755_v17 = vpop.permute.xlu0 %1754  ;;  %2125 = vrot.lane.b32.xlu1 %v2022_v60, %s2717_s13 }
 0x582   :  { %v1858_v55 = vsel %vm3679_vm4, %v3384_v47, %v1755_v17  ;;  %vm3690_vm4 = vcmask 785408  }
 0x583   :  { %v1757_v44 = vpop.permute.xlu1 %1756 }
 0x584   :  { %v1859_v58 = vsel %vm3681_vm6, %v3390_v33, %v1757_v44  ;;  %vm3692_vm6 = vmmov %vm3690_vm4 }
 0x585   :  { %v1763_v57 = vpop.permute.xlu0 %1762 }
 0x586   :  { %v1860_v15 = vsel %vm3680_vm5, %v1858_v55, %v1763_v57  ;;  %vm3691_vm5 = vmmov %vm3688_vm2 }
 0x587   :  { %v1765_v25 = vpop.permute.xlu1 %1764 }
 0x588   :  { %v1861_v61 = vsel %vm3682_vm7, %v1859_v58, %v1765_v25  ;;  %vm3693_vm7 = vcmask 64512  }
 0x589   :  { %v1779_v16 = vpop.permute.xlu0 %1778 }
 0x58b   :  { %v1781_v59 = vpop.permute.xlu1 %1780 }
 0x58d   :  { %v1817_v28 = vpop.permute.xlu0 %1816 }
 0x58f   :  { %v1819_v37 = vpop.permute.xlu1 %1818 }
 0x591   :  { %v1823_v2 = vpop.permute.xlu0 %1822 }
 0x593   :  { %v1825_v40 = vpop.permute.xlu1 %1824 }
 0x595   :  { %v3521_v63 = vpop.permute.xlu0 %2081 }
 0x597   :  { %v3523_v46 = vpop.permute.xlu1 %2083 }
 0x599   :  { %v1835_v47 = vpop.permute.xlu0 %1834 }
 0x59b   :  { %v1837_v38 = vpop.permute.xlu1 %1836 }
 0x59d   :  { %v1771_v19 = vpop.permute.xlu0 %1770 }
 0x59e   :  { %v1862_v5 = vsel %vm3683_vm8, %v1860_v15, %v1771_v19  ;;  %vm3694_vm8 = vcmask 130048  }
 0x59f   :  { %v1773_v23 = vpop.permute.xlu1 %1772  ;;  %v1864_v33 = vsel %vm779_vm14, %v1862_v5, %v1779_v16 }
 0x5a0   :  { %v1863_v41 = vsel %vm3684_vm11, %v1861_v61, %v1773_v23  ;;  %vm3695_vm11 = vmmov %vm3693_vm7 }
 0x5a1   :  { %v1787_v32 = vpop.permute.xlu0 %1786  ;;  %v1865_v0 = vsel %vm779_vm14, %v1863_v41, %v1781_v59 }
 0x5a2   :  { %v1866_v48 = vsel %vm782_vm15, %v1864_v33, %v1787_v32 }
 0x5a3   :  { %v1789_v1 = vpop.permute.xlu1 %1788 }
 0x5a4   :  { %v1867_v50 = vsel %vm782_vm15, %v1865_v0, %v1789_v1 }
 0x5a5   :  { %v1795_v53 = vpop.permute.xlu0 %1794 }
 0x5a6   :  { %v1868_v56 = vsel %vm785_vm10, %v1866_v48, %v1795_v53 }
 0x5a7   :  { %v1797_v13 = vpop.permute.xlu1 %1796 }
 0x5a8   :  { %v1869_v11 = vsel %vm785_vm10, %v1867_v50, %v1797_v13 }
 0x5a9   :  { %v2026_v22 = vpop.permute.xlu0 %2025 }
 0x5ab   :  { %v2028_v8 = vpop.permute.xlu1 %2027 }
 0x5ad   :  { %v2034_v26 = vpop.permute.xlu0 %2033 }
 0x5af   :  { %v2036_v12 = vpop.permute.xlu1 %2035 }
 0x5b1   :  { %v2050_v3 = vpop.permute.xlu0 %2049 }
 0x5b3   :  { %v2052_v43 = vpop.permute.xlu1 %2051 }
 0x5b5   :  { %v1829_v35 = vpop.permute.xlu0 %1828 }
 0x5b7   :  { %v1831_v45 = vpop.permute.xlu1 %1830 }
 0x5b9   :  { %v2088_v24 = vpop.permute.xlu0 %2087 }
 0x5bb   :  { %v3533_v4 = vpop.permute.xlu1 %2089 }
 0x5bd   :  { %v2094_v29 = vpop.permute.xlu0 %2093 }
 0x5bf   :  { %v3535_v31 = vpop.permute.xlu1 %2095 }
 0x5c1   :  { %v1841_v39 = vpop.permute.xlu0 %1840 }
 0x5c3   :  { %v1843_v21 = vpop.permute.xlu1 %1842 }
 0x5c5   :  { %v1847_v27 = vpop.permute.xlu0 %1846 }
 0x5c7   :  { %v1849_v52 = vpop.permute.xlu1 %1848 }
 0x5c9   :  { %v2106_v14 = vpop.permute.xlu0 %2105 }
 0x5cb   :  { %v3537_v54 = vpop.permute.xlu1 %2107 }
 0x5cd   :  { %v1803_v10 = vpop.permute.xlu0 %1802 }
 0x5ce   :  { %v1870_v34 = vsel %vm788_vm9, %v1868_v56, %v1803_v10 }
 0x5cf   :  { %v1872_v42 = vsel %vm82_vm0, %v1870_v34, %v1811_v36  ;;  %v1805_v51 = vpop.permute.xlu1 %1804 }
 0x5d0   :  { %v1874_v60 = vsel %vm3685_vm13, %v1872_v42, %v1817_v28  ;;  %v1871_v17 = vsel %vm788_vm9, %v1869_v11, %v1805_v51  ;;  %vm3696_vm13 = vcmask 195584  }
 0x5d1   :  { %v1876_v44 = vsel %vm3686_vm12, %v1874_v60, %v1823_v2  ;;  %v1873_v55 = vsel %vm82_vm0, %v1871_v17, %v1813_v6  ;;  %v2042_v57 = vpop.permute.xlu0 %2041  ;;  %vm3697_vm12 = vmmov %vm3694_vm8 }
 0x5d2   :  { %v1875_v15 = vsel %vm3687_vm1, %v1873_v55, %v1819_v37  ;;  %v1878_v58 = vsel %vm3688_vm2, %v1876_v44, %v1829_v35  ;;  %v2129_v37 = vsel %vm3693_vm7, %v3426_v20, %v2026_v22  ;;  %vm3698_vm1 = vmmov %vm3696_vm13  ;;  %vm3699_vm2 = vcmask 850944  }
 0x5d3   :  { %v1877_v25 = vsel %vm3689_vm3, %v1875_v15, %v1825_v40  ;;  %v2044_v61 = vpop.permute.xlu1 %2043  ;;  %v1880_v16 = vsel %vm3690_vm4, %v1878_v58, %v1835_v47  ;;  %v2131_v41 = vsel %vm3694_vm8, %v2129_v37, %v2034_v26  ;;  %v2130_v47 = vsel %vm3695_vm11, %v3431_v62, %v2028_v8  ;;  %vm3700_vm3 = vmmov %vm3699_vm2 }
 0x5d4   :  { %v1879_v36 = vsel %vm3691_vm5, %v1877_v25, %v1831_v45  ;;  %v2133_v32 = vsel %vm3696_vm13, %v2131_v41, %v2042_v57  ;;  %v2132_v0 = vsel %vm3697_vm12, %v2130_v47, %v2036_v12  ;;  %v1882_v20 = vsel %vm3699_vm2, %v1880_v16, %v1841_v39 }
 0x5d5   :  { %v2058_v59 = vpop.permute.xlu0 %2057  ;;  %v1881_v28 = vsel %vm3692_vm6, %v1879_v36, %v1837_v38  ;;  %v2134_v48 = vsel %vm3698_vm1, %v2132_v0, %v2044_v61  ;;  %v2135_v1 = vsel %vm779_vm14, %v2133_v32, %v2050_v3  ;;  %vm3701_vm4 = vcmask 916480  }
 0x5d6   :  { %v2137_v53 = vsel %vm782_vm15, %v2135_v1, %v2058_v59  ;;  %v2136_v56 = vsel %vm779_vm14, %v2134_v48, %v2052_v43  ;;  %v1883_v62 = vsel %vm3700_vm3, %v1881_v28, %v1843_v21  ;;  %v1884_v12 = vsel %vm3701_vm4, %v1882_v20, %v1847_v27  ;;  %vm3703_vm14 = vmmov %vm3701_vm4 }
 0x5d7   :  { %v2060_v19 = vpop.permute.xlu1 %2059  ;;  %vm3702_vm5 = vcmask 982016   ;;  %v1885_v43 = vsel %vm3703_vm14, %v1883_v62, %v1849_v52  ;;  %vm3704_vm6 = vcmask 588800   ;;  %vm3708_vm8 = vcmask 719872  }
 0x5d8   :  { %v2138_v22 = vsel %vm782_vm15, %v2136_v56, %v2060_v19  ;;  %vm3705_vm7 = vmmov %vm3702_vm5  ;;  %vm3706_vm15 = vcmask 654336   ;;  %vm3710_vm13 = vcmask 785408  }
 0x5d9   :  { %v2066_v5 = vpop.permute.xlu0 %2065  ;;  %vm3709_vm11 = vmmov %vm3706_vm15 }
 0x5da   :  { %v2139_v13 = vsel %vm785_vm10, %v2137_v53, %v2066_v5  ;;  %vm3712_vm12 = vmmov %vm3708_vm8 }
 0x5db   :  { %v2068_v2 = vpop.permute.xlu1 %2067  ;;  %vm3714_vm1 = vmmov %vm3710_vm13 }
 0x5dc   :  { %v2140_v26 = vsel %vm785_vm10, %v2138_v22, %v2068_v2  ;;  %vm3707_vm10 = vmmov %vm3704_vm6 }
 0x5dd   :  { %v2100_v23 = vpop.permute.xlu0 %2099  ;;  %vm3715_vm3 = vmmov %vm3702_vm5 }
 0x5df   :  { %v2102_v6 = vpop.permute.xlu1 %2101 }
 0x5e1   :  { %v1853_v33 = vpop.permute.xlu0 %1852 }
 0x5e2   :  { %v1886_v45 = vsel %vm3702_vm5, %v1884_v12, %v1853_v33  ;;  %vm3717_vm5 = vmmov %vm3715_vm3 }
 0x5e3   :  { %v1855_v40 = vpop.permute.xlu1 %1854  ;;  %v2162_v60 = vrot.slane %v1886_v45, %v2910_v30 }
 0x5e4   :  { %v1887_v10 = vsel %vm3705_vm7, %v1885_v43, %v1855_v40 }
 0x5e5   :  { %v2112_v38 = vpop.permute.xlu0 %2111  ;;  %v2166_v44 = vrot.slane %v1887_v10, %v2910_v30 }
 0x5e7   :  { %v2114_v50 = vpop.permute.xlu1 %2113  ;;  %v2169_v36 = vmul.f32 %v2166_v44, %v3350_v18 }
 0x5e9   :  { %v2074_v11 = vpop.permute.xlu0 %2073 }
 0x5ea   :  { %v2141_v8 = vsel %vm788_vm9, %v2139_v13, %v2074_v11 }
 0x5eb   :  { %v2143_v3 = vsel %vm82_vm0, %v2141_v8, %v3521_v63  ;;  %v2076_v35 = vpop.permute.xlu1 %2075 }
 0x5ec   :  { %v2145_v39 = vsel %vm3704_vm6, %v2143_v3, %v2088_v24  ;;  %v2142_v21 = vsel %vm788_vm9, %v2140_v26, %v2076_v35  ;;  %vm3711_vm9 = vmmov %vm3699_vm2 }
 0x5ed   :  { %v2147_v34 = vsel %vm3706_vm15, %v2145_v39, %v2094_v29  ;;  %v2144_v42 = vsel %vm82_vm0, %v2142_v21, %v3523_v46  ;;  %v2118_v27 = vpop.permute.xlu0 %2117  ;;  %vm3713_vm0 = vmmov %vm3701_vm4 }
 0x5ee   :  { %v2146_v63 = vsel %vm3707_vm10, %v2144_v42, %v3533_v4  ;;  %v2149_v51 = vsel %vm3708_vm8, %v2147_v34, %v2100_v23  ;;  %vm3716_vm4 = vmmov %vm3713_vm0 }
 0x5ef   :  { %v2148_v24 = vsel %vm3709_vm11, %v2146_v63, %v3535_v31  ;;  %v2151_v52 = vsel %vm3710_vm13, %v2149_v51, %v2106_v14  ;;  %v2120_v17 = vpop.permute.xlu1 %2119  ;;  %v2167_v31 = vmul.f32 %v2162_v60, %v3352_v49  ;;  %v2168_v14 = vmul.f32 %v2162_v60, %v3360_v9 }
 0x5f0   :  { %v2153_v29 = vsel %vm3711_vm9, %v2151_v52, %v2112_v38  ;;  %v2150_v46 = vsel %vm3712_vm12, %v2148_v24, %v2102_v6 }
 0x5f1   :  { %v2155_v55 = vsel %vm3713_vm0, %v2153_v29, %v2118_v27  ;;  %v2152_v4 = vsel %vm3714_vm1, %v2150_v46, %v3537_v54  ;;  %v2124_v57 = vpop.permute.xlu0 %2123  ;;  %v2170_v54 = vmul.f32 %v2166_v44, %v3356_v7 }
 0x5f2   :  { %v2154_v15 = vsel %vm3699_vm2, %v2152_v4, %v2114_v50  ;;  %v2157_v58 = vsel %vm3715_vm3, %v2155_v55, %v2124_v57 }
 0x5f3   :  { %v2156_v25 = vsel %vm3716_vm4, %v2154_v15, %v2120_v17  ;;  %v2174_v61 = vrot.slane %v2157_v58, %v2910_v30  ;;  %v2126_v16 = vpop.permute.xlu1 %2125 }
 0x5f4   :  { %v2158_v59 = vsel %vm3717_vm5, %v2156_v25, %v2126_v16 }
 0x5f5   :  { %v2179_v28 = vadd.f32 %v2174_v61, %v2167_v31  ;;  %v2180_v19 = vadd.f32 %v2174_v61, %v2168_v14  ;;  %v2178_v5 = vrot.slane %v2158_v59, %v2910_v30 }
 0x5f7   :  { %v2183_v49 = vmax.f32 %v2179_v28, 0.0  ;;  %v2184_v2 = vmax.f32 %v2180_v19, 0.0  ;;  %v2181_v9 = vadd.f32 %v2178_v5, %v2169_v36  ;;  %v2182_v23 = vadd.f32 %v2178_v5, %v2170_v54 }
 0x5f9   :  { %2187 = vst [vmem:[#allocation5] sm:$0xff] %v2183_v49  ;;  %2188 = vst [vmem:[#allocation5 + $0x8] sm:$0xff] %v2184_v2  ;;  %v2185_v6 = vmax.f32 %v2181_v9, 0.0  ;;  %v2186_v33 = vmax.f32 %v2182_v23, 0.0 }
 0x5fb   :  { %2189 = vst [vmem:[#allocation5 + $0x10] sm:$0xff] %v2185_v6  ;;  %2190 = vst [vmem:[#allocation5 + $0x18] sm:$0xff] %v2186_v33 }
 0x5fc   :  { %2680 = shalt.err (!%p2677_p12)
}
 0x5fd   :  { %s2681_s18 = scalar_lea.hbm %s3620_s5, 512 }
 0x5fe   :  { %p2682_p13 = scmp.ne.s32.totalorder %s3620_s5, %s2681_s18  ;;  %p2685_p0 = scmp.lt.u32.totalorder %s2681_s18, %s3620_s5 }
 0x600   :  { %p2687_p1 = pnand %p2685_p0, %p2682_p13 }
 0x602   :  { %2690 = shalt.err (!%p2687_p1)
}
 0x603   :  { %s2719_s23 = smov 128  }
 0x604   :  { %2202 = dma.vmem_to_hbm [thread:$0]  %s2197_s28, 512, %s3620_s5, [#allocation4], %s2719_s23, %s2719_s23, %s2704_s3  }
 0x605   :  { %2693 = dma.done.wait [#allocation4], 512  }
 0x606   :  { %2694 = vsyncadd [#allocation4], 4294966784 }
 0x607   :  { %2206 = vsyncpa [#allocation3], 1 }
 0x608   :  { %2207 = vsyncpa [#allocation4], 1 }

</bundles_post_ra>
